<compile_context>
chip_gen: v5e
topology: v5e:2x2
jax: 0.10.0
libtpu: 0.0.40
codegen_flags: <defaults>
</compile_context>

<pallas_src>
import functools

import jax
import jax.numpy as jnp
from jax.experimental import pallas as pl
from jax.experimental.pallas import tpu as pltpu


def _layer_norm(v, w, b, eps=1e-5):
    mu = jnp.mean(v, axis=-1, keepdims=True)
    var = jnp.mean((v - mu) ** 2, axis=-1, keepdims=True)
    return (v - mu) * jax.lax.rsqrt(var + eps) * w + b


def _residual_attn_block_kernel(
    x_q_ref, x_kv_ref,
    ln1_w_ref, ln1_b_ref,
    wq_ref, bq_ref,
    wkv_ref, bkv_ref,
    wo_ref, bo_ref,
    ln2_w_ref, ln2_b_ref,
    wfc_ref, bfc_ref,
    wpr_ref, bpr_ref,
    o_ref,
    k_scr, v_scr,
    *, n_head: int,
):
    f32 = jnp.float32
    bf16 = jnp.bfloat16

    s_len, d_model = x_kv_ref.shape
    bq_len = x_q_ref.shape[0]
    dh = d_model // n_head
    scale = 1.0 / (dh ** 0.5)

    # ---- K/V: LN1 + fused (D, 2D) projection, once per batch row ----
    @pl.when(pl.program_id(1) == 0)
    def _():
        x_kv = x_kv_ref[...].astype(f32)                     # (S, D)
        hkv = _layer_norm(x_kv, ln1_w_ref[...], ln1_b_ref[...]).astype(bf16)
        kv = jnp.dot(hkv, wkv_ref[...],
                     preferred_element_type=f32) + bkv_ref[...]  # (S, 2D) f32
        k = kv[:, :d_model].astype(bf16).reshape(s_len, n_head, dh)
        v = kv[:, d_model:].astype(bf16).reshape(s_len, n_head, dh)
        k_scr[...] = jnp.transpose(k, (1, 0, 2))             # (H, S, dh)
        v_scr[...] = jnp.transpose(v, (1, 0, 2))             # (H, S, dh)

    # ---- Q projection for this q tile (full-width (D, D) matmul) ----
    x_q = x_q_ref[...].astype(f32)                           # (bq, D) residual
    hq = _layer_norm(x_q, ln1_w_ref[...], ln1_b_ref[...]).astype(bf16)
    q = jnp.dot(hq, wq_ref[...], preferred_element_type=f32) + bq_ref[...]
    q = (q * scale).astype(bf16).reshape(bq_len, n_head, dh)
    q = jnp.transpose(q, (1, 0, 2))                          # (H, bq, dh)

    # ---- attention (softmax in f32, exact reciprocal) ----
    scores = jnp.einsum("hqd,hkd->hqk", q, k_scr[...],
                        preferred_element_type=f32)          # (H, bq, S)
    scores = scores - jnp.max(scores, axis=-1, keepdims=True)
    p = jnp.exp(scores)
    p = p / jnp.sum(p, axis=-1, keepdims=True)

    ctx = jnp.einsum("hqk,hkd->hqd", p.astype(bf16), v_scr[...],
                     preferred_element_type=f32)             # (H, bq, dh)
    ctx = jnp.transpose(ctx, (1, 0, 2)).reshape(bq_len, d_model).astype(bf16)

    # ---- output projection: single (bq, D) x (D, D) matmul ----
    attn = jnp.dot(ctx, wo_ref[...], preferred_element_type=f32) + bo_ref[...]
    x1 = x_q + attn

    # ---- ln_2 + MLP (Linear -> QuickGELU -> Linear) ----
    h2 = _layer_norm(x1, ln2_w_ref[...], ln2_b_ref[...]).astype(bf16)
    fc = jnp.dot(h2, wfc_ref[...], preferred_element_type=f32) + bfc_ref[...]
    fc = fc * jax.nn.sigmoid(1.702 * fc)                     # QuickGELU (f32)
    pr = jnp.dot(fc.astype(bf16), wpr_ref[...],
                 preferred_element_type=f32) + bpr_ref[...]
    o_ref[...] = (x1 + pr).astype(o_ref.dtype)


def residual_attention_block(x, params, n_head, block_q=None):
    """x: (B, S, D) float32. params: dict of pre-transposed (in, out) f32 weights."""
    B, S, D = x.shape
    assert D % n_head == 0
    dh = D // n_head

    if block_q is None:
        if S <= 256:
            block_q = S
        elif S % 256 == 0:
            block_q = 256
        else:
            block_q = 128
    assert S % block_q == 0, "S must be divisible by block_q"
    num_q = S // block_q

    f32 = jnp.float32
    bf16 = jnp.bfloat16

    # Fuse K/V projections into one lane-dense (D, 2D) weight / (1, 2D) bias.
    wkv = jnp.concatenate([params["wk"], params["wv"]], axis=1).astype(bf16)
    bkv = jnp.concatenate([params["bk"], params["bv"]], axis=1).astype(f32)

    param_list = [
        params["ln1_w"].astype(f32), params["ln1_b"].astype(f32),
        params["wq"].astype(bf16), params["bq"].astype(f32),
        wkv, bkv,
        params["wo"].astype(bf16), params["bo"].astype(f32),
        params["ln2_w"].astype(f32), params["ln2_b"].astype(f32),
        params["wfc"].astype(bf16), params["bfc"].astype(f32),
        params["wpr"].astype(bf16), params["bpr"].astype(f32),
    ]

    def const_spec(p):
        nd = p.ndim
        return pl.BlockSpec(p.shape, lambda b, qi, _n=nd: (0,) * _n)

    x_q_spec = pl.BlockSpec((None, block_q, D), lambda b, qi: (b, qi, 0))
    x_kv_spec = pl.BlockSpec((None, S, D), lambda b, qi: (b, 0, 0))
    out_spec = pl.BlockSpec((None, block_q, D), lambda b, qi: (b, qi, 0))
    param_specs = [const_spec(p) for p in param_list]

    kernel = functools.partial(_residual_attn_block_kernel, n_head=n_head)

    # VMEM budget derived from actual block / scratch / weight footprints
    # (double-buffered inputs/outputs, single copy of K/V scratch + scores).
    weight_bytes = sum(int(p.size) * p.dtype.itemsize for p in param_list)
    vmem_est = (
        2 * (S * D * 2)                     # bf16 KV input stream
        + 4 * (block_q * D * 4)             # f32 q tile + f32 output tile
        + 2 * weight_bytes                  # double-buffered weights
        + 2 * (S * D * 2)                   # bf16 K/V scratch
        + 2 * (n_head * block_q * S * 4)    # f32 scores + probs
    )
    vmem_limit = min(max(int(vmem_est * 1.5), 16 * 1024 * 1024),
                     96 * 1024 * 1024)

    # Advisory cost estimate so XLA can overlap surrounding ops.
    flops = int(B * (12 * S * D * D + 4 * S * S * D))
    transcendentals = int(B * (n_head * S * S + S * D))
    bytes_accessed = int(2 * x.size * 4 + x.size * 2 + weight_bytes)
    cost = pl.CostEstimate(flops=flops, transcendentals=transcendentals,
                           bytes_accessed=bytes_accessed)

    return pl.pallas_call(
        kernel,
        out_shape=jax.ShapeDtypeStruct((B, S, D), x.dtype),
        grid_spec=pltpu.PrefetchScalarGridSpec(
            num_scalar_prefetch=0,
            grid=(B, num_q),
            in_specs=[x_q_spec, x_kv_spec] + param_specs,
            out_specs=out_spec,
            scratch_shapes=[
                pltpu.VMEM((n_head, S, dh), bf16),   # cached K
                pltpu.VMEM((n_head, S, dh), bf16),   # cached V
            ],
        ),
        compiler_params=pltpu.CompilerParams(
            # qi must be "arbitrary": K/V scratch is filled at qi == 0 and
            # reused for qi > 0 of the same batch row.  B stays "parallel"
            # so v7x's two TensorCores both get work.
            dimension_semantics=("parallel", "arbitrary"),
            vmem_limit_bytes=vmem_limit,
        ),
        cost_estimate=cost,
    )(x, x.astype(bf16), *param_list)


def _reference(x, params, n_head):
    """Plain-JAX f32 reference with the PyTorch module's math (for validation)."""
    B, S, D = x.shape
    dh = D // n_head
    scale = 1.0 / (dh ** 0.5)

    def ln(v, w, b):
        mu = jnp.mean(v, axis=-1, keepdims=True)
        var = jnp.mean((v - mu) ** 2, axis=-1, keepdims=True)
        return (v - mu) * jax.lax.rsqrt(var + 1e-5) * w + b

    h = ln(x, params["ln1_w"], params["ln1_b"])
    q = h @ params["wq"] + params["bq"]
    k = h @ params["wk"] + params["bk"]
    v = h @ params["wv"] + params["bv"]
    q = q.reshape(B, S, n_head, dh).transpose(0, 2, 1, 3)
    k = k.reshape(B, S, n_head, dh).transpose(0, 2, 1, 3)
    v = v.reshape(B, S, n_head, dh).transpose(0, 2, 1, 3)
    s = jnp.einsum("bhqd,bhkd->bhqk", q, k) * scale
    p = jax.nn.softmax(s, axis=-1)
    a = jnp.einsum("bhqk,bhkd->bhqd", p, v).transpose(0, 2, 1, 3).reshape(B, S, D)
    a = a @ params["wo"] + params["bo"]
    x = x + a

    h2 = ln(x, params["ln2_w"], params["ln2_b"])
    fc = h2 @ params["wfc"] + params["bfc"]
    fc = fc * jax.nn.sigmoid(1.702 * fc)
    pr = fc @ params["wpr"] + params["bpr"]
    return x + pr


def init_params(key, d_model):
    """Deterministic synthetic parameters; weights pre-transposed to (in, out)."""
    ks = jax.random.split(key, 8)
    s = 0.02
    in_proj_w = jax.random.normal(ks[0], (3 * d_model, d_model), jnp.float32) * s
    in_proj_b = jax.random.normal(ks[1], (3 * d_model,), jnp.float32) * s
    out_proj_w = jax.random.normal(ks[2], (d_model, d_model), jnp.float32) * s
    out_proj_b = jax.random.normal(ks[3], (d_model,), jnp.float32) * s
    fc_w = jax.random.normal(ks[4], (d_model, d_model), jnp.float32) * s
    fc_b = jax.random.normal(ks[5], (d_model,), jnp.float32) * s
    pr_w = jax.random.normal(ks[6], (d_model, d_model), jnp.float32) * s
    pr_b = jax.random.normal(ks[7], (d_model,), jnp.float32) * s

    D = d_model
    return {
        "ln1_w": jnp.ones((1, D), jnp.float32),
        "ln1_b": jnp.zeros((1, D), jnp.float32),
        # PyTorch Linear computes x @ W.T + b, so pass W.T as (in, out).
        "wq": in_proj_w[0 * D:1 * D].T,
        "wk": in_proj_w[1 * D:2 * D].T,
        "wv": in_proj_w[2 * D:3 * D].T,
        "bq": in_proj_b[0 * D:1 * D].reshape(1, D),
        "bk": in_proj_b[1 * D:2 * D].reshape(1, D),
        "bv": in_proj_b[2 * D:3 * D].reshape(1, D),
        "wo": out_proj_w.T,
        "bo": out_proj_b.reshape(1, D),
        "ln2_w": jnp.ones((1, D), jnp.float32),
        "ln2_b": jnp.zeros((1, D), jnp.float32),
        "wfc": fc_w.T,
        "bfc": fc_b.reshape(1, D),
        "wpr": pr_w.T,
        "bpr": pr_b.reshape(1, D),
    }


if __name__ == "__main__":
    key = jax.random.PRNGKey(0)

    # Case 1: single q-tile per row (blocks == full dims).
    B, S, D, H = 2, 8, 32, 4
    kx, kp, kx2 = jax.random.split(key, 3)
    x = jax.random.normal(kx, (B, S, D), jnp.float32)
    params = init_params(kp, D)

    out = jax.block_until_ready(residual_attention_block(x, params, n_head=H))
    ref = _reference(x, params, n_head=H)
    assert out.shape == (B, S, D)
    err = float(jnp.max(jnp.abs(out - ref)))
    assert jnp.allclose(out, ref, atol=2e-2, rtol=2e-2), f"case1 max abs err={err}"

    # Case 2: num_q > 1 — exercises the q-tiling path and the K/V scratch
    # caching across qi (qi axis "arbitrary").
    S2 = 16
    x2 = jax.random.normal(kx2, (B, S2, D), jnp.float32)
    out2 = jax.block_until_ready(
        residual_attention_block(x2, params, n_head=H, block_q=8))
    ref2 = _reference(x2, params, n_head=H)
    err2 = float(jnp.max(jnp.abs(out2 - ref2)))
    assert jnp.allclose(out2, ref2, atol=2e-2, rtol=2e-2), f"case2 max abs err={err2}"

    print("KERNEL_OK")
</pallas_src>

<mosaic_0001>
module attributes {stable_mosaic.version = 11 : i64} {
  func.func @_residual_attn_block_kernel(%arg0: i32, %arg1: i32, %arg2: memref<1x8x32xf32, #tpu.memory_space<vmem>>, %arg3: memref<1x8x32xbf16, #tpu.memory_space<vmem>>, %arg4: memref<1x32xf32, #tpu.memory_space<vmem>>, %arg5: memref<1x32xf32, #tpu.memory_space<vmem>>, %arg6: memref<32x32xbf16, #tpu.memory_space<vmem>>, %arg7: memref<1x32xf32, #tpu.memory_space<vmem>>, %arg8: memref<32x64xbf16, #tpu.memory_space<vmem>>, %arg9: memref<1x64xf32, #tpu.memory_space<vmem>>, %arg10: memref<32x32xbf16, #tpu.memory_space<vmem>>, %arg11: memref<1x32xf32, #tpu.memory_space<vmem>>, %arg12: memref<1x32xf32, #tpu.memory_space<vmem>>, %arg13: memref<1x32xf32, #tpu.memory_space<vmem>>, %arg14: memref<32x32xbf16, #tpu.memory_space<vmem>>, %arg15: memref<1x32xf32, #tpu.memory_space<vmem>>, %arg16: memref<32x32xbf16, #tpu.memory_space<vmem>>, %arg17: memref<1x32xf32, #tpu.memory_space<vmem>>, %arg18: memref<1x8x32xf32, #tpu.memory_space<vmem>>, %arg19: memref<4x8x8xbf16, #tpu.memory_space<vmem>>, %arg20: memref<4x8x8xbf16, #tpu.memory_space<vmem>>) attributes {dimension_semantics = [#tpu.dimension_semantics<parallel>, #tpu.dimension_semantics<arbitrary>], iteration_bounds = array<i64: 2, 1>, scalar_prefetch = 0 : i64, scratch_operands = 2 : i64, tpu.core_type = #tpu.core_type<tc>, window_params = [{transform_indices = @transform_0, window_bounds = array<i64: 1, 8, 32>}, {transform_indices = @transform_1, window_bounds = array<i64: 1, 8, 32>}, {pipeline_mode = #tpu.pipeline_mode<synchronous>, transform_indices = @transform_2, window_bounds = array<i64: 1, 32>}, {pipeline_mode = #tpu.pipeline_mode<synchronous>, transform_indices = @transform_3, window_bounds = array<i64: 1, 32>}, {pipeline_mode = #tpu.pipeline_mode<synchronous>, transform_indices = @transform_4, window_bounds = array<i64: 32, 32>}, {pipeline_mode = #tpu.pipeline_mode<synchronous>, transform_indices = @transform_5, window_bounds = array<i64: 1, 32>}, {pipeline_mode = #tpu.pipeline_mode<synchronous>, transform_indices = @transform_6, window_bounds = array<i64: 32, 64>}, {pipeline_mode = #tpu.pipeline_mode<synchronous>, transform_indices = @transform_7, window_bounds = array<i64: 1, 64>}, {pipeline_mode = #tpu.pipeline_mode<synchronous>, transform_indices = @transform_8, window_bounds = array<i64: 32, 32>}, {pipeline_mode = #tpu.pipeline_mode<synchronous>, transform_indices = @transform_9, window_bounds = array<i64: 1, 32>}, {pipeline_mode = #tpu.pipeline_mode<synchronous>, transform_indices = @transform_10, window_bounds = array<i64: 1, 32>}, {pipeline_mode = #tpu.pipeline_mode<synchronous>, transform_indices = @transform_11, window_bounds = array<i64: 1, 32>}, {pipeline_mode = #tpu.pipeline_mode<synchronous>, transform_indices = @transform_12, window_bounds = array<i64: 32, 32>}, {pipeline_mode = #tpu.pipeline_mode<synchronous>, transform_indices = @transform_13, window_bounds = array<i64: 1, 32>}, {pipeline_mode = #tpu.pipeline_mode<synchronous>, transform_indices = @transform_14, window_bounds = array<i64: 32, 32>}, {pipeline_mode = #tpu.pipeline_mode<synchronous>, transform_indices = @transform_15, window_bounds = array<i64: 1, 32>}, {transform_indices = @transform_16, window_bounds = array<i64: 1, 8, 32>}]} {
    %c0_i32 = arith.constant 0 : i32
    %0 = arith.cmpi eq, %arg1, %c0_i32 : i32
    %1 = arith.extui %0 : i1 to i32
    %c0_i32_0 = arith.constant 0 : i32
    %2 = arith.cmpi ne, %1, %c0_i32_0 : i32
    scf.if %2 {
      %c0_56 = arith.constant 0 : index
      %c0_57 = arith.constant 0 : index
      %c0_58 = arith.constant 0 : index
      %111 = vector.load %arg3[%c0_56, %c0_57, %c0_58] : memref<1x8x32xbf16, #tpu.memory_space<vmem>>, vector<1x8x32xbf16>
      %112 = vector.shape_cast %111 : vector<1x8x32xbf16> to vector<8x32xbf16>
      %113 = arith.extf %112 : vector<8x32xbf16> to vector<8x32xf32>
      %c0_59 = arith.constant 0 : index
      %c0_60 = arith.constant 0 : index
      %114 = vector.load %arg4[%c0_59, %c0_60] : memref<1x32xf32, #tpu.memory_space<vmem>>, vector<1x32xf32>
      %c0_61 = arith.constant 0 : index
      %c0_62 = arith.constant 0 : index
      %115 = vector.load %arg5[%c0_61, %c0_62] : memref<1x32xf32, #tpu.memory_space<vmem>>, vector<1x32xf32>
      %cst_63 = arith.constant dense<0.000000e+00> : vector<8xf32>
      %116 = vector.multi_reduction <add>, %113, %cst_63 [1] : vector<8x32xf32> to vector<8xf32>
      %117 = vector.shape_cast %116 : vector<8xf32> to vector<8x1xf32>
      %cst_64 = arith.constant 3.200000e+01 : f32
      %118 = vector.broadcast %cst_64 : f32 to vector<8x1xf32>
      %119 = arith.divf %117, %118 : vector<8x1xf32>
      %120 = vector.broadcast %119 : vector<8x1xf32> to vector<8x32xf32>
      %121 = arith.subf %113, %120 : vector<8x32xf32>
      %122 = arith.mulf %121, %121 : vector<8x32xf32>
      %cst_65 = arith.constant dense<0.000000e+00> : vector<8xf32>
      %123 = vector.multi_reduction <add>, %122, %cst_65 [1] : vector<8x32xf32> to vector<8xf32>
      %124 = vector.shape_cast %123 : vector<8xf32> to vector<8x1xf32>
      %cst_66 = arith.constant 3.200000e+01 : f32
      %125 = vector.broadcast %cst_66 : f32 to vector<8x1xf32>
      %126 = arith.divf %124, %125 : vector<8x1xf32>
      %127 = vector.broadcast %119 : vector<8x1xf32> to vector<8x32xf32>
      %128 = arith.subf %113, %127 : vector<8x32xf32>
      %cst_67 = arith.constant 9.99999974E-6 : f32
      %129 = vector.broadcast %cst_67 : f32 to vector<8x1xf32>
      %130 = arith.addf %126, %129 : vector<8x1xf32>
      %131 = math.rsqrt %130 : vector<8x1xf32>
      %132 = vector.broadcast %131 : vector<8x1xf32> to vector<8x32xf32>
      %133 = arith.mulf %128, %132 : vector<8x32xf32>
      %134 = vector.broadcast %114 : vector<1x32xf32> to vector<8x32xf32>
      %135 = arith.mulf %133, %134 : vector<8x32xf32>
      %136 = vector.broadcast %115 : vector<1x32xf32> to vector<8x32xf32>
      %137 = arith.addf %135, %136 : vector<8x32xf32>
      %138 = arith.truncf %137 : vector<8x32xf32> to vector<8x32xbf16>
      %c0_68 = arith.constant 0 : index
      %c0_69 = arith.constant 0 : index
      %139 = vector.load %arg8[%c0_68, %c0_69] : memref<32x64xbf16, #tpu.memory_space<vmem>>, vector<32x64xbf16>
      %cst_70 = arith.constant dense<0.000000e+00> : vector<8x64xf32>
      %140 = tpu.matmul %138, %139, %cst_70 {dimension_numbers = #tpu.dot_dimension_numbers<[1], [0], [0], [1], [0, 0, 1, 1], [], []>} : vector<8x32xbf16>, vector<32x64xbf16>, vector<8x64xf32> -> vector<8x64xf32>
      %c0_71 = arith.constant 0 : index
      %c0_72 = arith.constant 0 : index
      %141 = vector.load %arg9[%c0_71, %c0_72] : memref<1x64xf32, #tpu.memory_space<vmem>>, vector<1x64xf32>
      %142 = vector.broadcast %141 : vector<1x64xf32> to vector<8x64xf32>
      %143 = arith.addf %140, %142 : vector<8x64xf32>
      %144 = vector.extract_strided_slice %143 {offsets = [0, 0], sizes = [8, 32], strides = [1, 1]} : vector<8x64xf32> to vector<8x32xf32>
      %145 = arith.truncf %144 : vector<8x32xf32> to vector<8x32xbf16>
      %146 = vector.shape_cast %145 : vector<8x32xbf16> to vector<8x4x8xbf16>
      %147 = vector.extract_strided_slice %143 {offsets = [0, 32], sizes = [8, 32], strides = [1, 1]} : vector<8x64xf32> to vector<8x32xf32>
      %148 = arith.truncf %147 : vector<8x32xf32> to vector<8x32xbf16>
      %149 = vector.shape_cast %148 : vector<8x32xbf16> to vector<8x4x8xbf16>
      %150 = tpu.transpose %146, [1, 0, 2] : vector<8x4x8xbf16> -> vector<4x8x8xbf16>
      %c0_73 = arith.constant 0 : index
      %c0_74 = arith.constant 0 : index
      %c0_75 = arith.constant 0 : index
      %151 = vector.load %arg19[%c0_73, %c0_74, %c0_75] : memref<4x8x8xbf16, #tpu.memory_space<vmem>>, vector<4x8x8xbf16>
      tpu.vector_store %arg19[%c0_73, %c0_74, %c0_75], %150 {strides = array<i32>} : memref<4x8x8xbf16, #tpu.memory_space<vmem>>, vector<4x8x8xbf16>,
      %152 = tpu.transpose %149, [1, 0, 2] : vector<8x4x8xbf16> -> vector<4x8x8xbf16>
      %c0_76 = arith.constant 0 : index
      %c0_77 = arith.constant 0 : index
      %c0_78 = arith.constant 0 : index
      %153 = vector.load %arg20[%c0_76, %c0_77, %c0_78] : memref<4x8x8xbf16, #tpu.memory_space<vmem>>, vector<4x8x8xbf16>
      tpu.vector_store %arg20[%c0_76, %c0_77, %c0_78], %152 {strides = array<i32>} : memref<4x8x8xbf16, #tpu.memory_space<vmem>>, vector<4x8x8xbf16>,
    } else {
    }
    %c0 = arith.constant 0 : index
    %c0_1 = arith.constant 0 : index
    %c0_2 = arith.constant 0 : index
    %3 = vector.load %arg2[%c0, %c0_1, %c0_2] : memref<1x8x32xf32, #tpu.memory_space<vmem>>, vector<1x8x32xf32>
    %4 = vector.shape_cast %3 : vector<1x8x32xf32> to vector<8x32xf32>
    %c0_3 = arith.constant 0 : index
    %c0_4 = arith.constant 0 : index
    %5 = vector.load %arg4[%c0_3, %c0_4] : memref<1x32xf32, #tpu.memory_space<vmem>>, vector<1x32xf32>
    %c0_5 = arith.constant 0 : index
    %c0_6 = arith.constant 0 : index
    %6 = vector.load %arg5[%c0_5, %c0_6] : memref<1x32xf32, #tpu.memory_space<vmem>>, vector<1x32xf32>
    %cst = arith.constant dense<0.000000e+00> : vector<8xf32>
    %7 = vector.multi_reduction <add>, %4, %cst [1] : vector<8x32xf32> to vector<8xf32>
    %8 = vector.shape_cast %7 : vector<8xf32> to vector<8x1xf32>
    %cst_7 = arith.constant 3.200000e+01 : f32
    %9 = vector.broadcast %cst_7 : f32 to vector<8x1xf32>
    %10 = arith.divf %8, %9 : vector<8x1xf32>
    %11 = vector.broadcast %10 : vector<8x1xf32> to vector<8x32xf32>
    %12 = arith.subf %4, %11 : vector<8x32xf32>
    %13 = arith.mulf %12, %12 : vector<8x32xf32>
    %cst_8 = arith.constant dense<0.000000e+00> : vector<8xf32>
    %14 = vector.multi_reduction <add>, %13, %cst_8 [1] : vector<8x32xf32> to vector<8xf32>
    %15 = vector.shape_cast %14 : vector<8xf32> to vector<8x1xf32>
    %cst_9 = arith.constant 3.200000e+01 : f32
    %16 = vector.broadcast %cst_9 : f32 to vector<8x1xf32>
    %17 = arith.divf %15, %16 : vector<8x1xf32>
    %18 = vector.broadcast %10 : vector<8x1xf32> to vector<8x32xf32>
    %19 = arith.subf %4, %18 : vector<8x32xf32>
    %cst_10 = arith.constant 9.99999974E-6 : f32
    %20 = vector.broadcast %cst_10 : f32 to vector<8x1xf32>
    %21 = arith.addf %17, %20 : vector<8x1xf32>
    %22 = math.rsqrt %21 : vector<8x1xf32>
    %23 = vector.broadcast %22 : vector<8x1xf32> to vector<8x32xf32>
    %24 = arith.mulf %19, %23 : vector<8x32xf32>
    %25 = vector.broadcast %5 : vector<1x32xf32> to vector<8x32xf32>
    %26 = arith.mulf %24, %25 : vector<8x32xf32>
    %27 = vector.broadcast %6 : vector<1x32xf32> to vector<8x32xf32>
    %28 = arith.addf %26, %27 : vector<8x32xf32>
    %29 = arith.truncf %28 : vector<8x32xf32> to vector<8x32xbf16>
    %c0_11 = arith.constant 0 : index
    %c0_12 = arith.constant 0 : index
    %30 = vector.load %arg6[%c0_11, %c0_12] : memref<32x32xbf16, #tpu.memory_space<vmem>>, vector<32x32xbf16>
    %cst_13 = arith.constant dense<0.000000e+00> : vector<8x32xf32>
    %31 = tpu.matmul %29, %30, %cst_13 {dimension_numbers = #tpu.dot_dimension_numbers<[1], [0], [0], [1], [0, 0, 1, 1], [], []>} : vector<8x32xbf16>, vector<32x32xbf16>, vector<8x32xf32> -> vector<8x32xf32>
    %c0_14 = arith.constant 0 : index
    %c0_15 = arith.constant 0 : index
    %32 = vector.load %arg7[%c0_14, %c0_15] : memref<1x32xf32, #tpu.memory_space<vmem>>, vector<1x32xf32>
    %33 = vector.broadcast %32 : vector<1x32xf32> to vector<8x32xf32>
    %34 = arith.addf %31, %33 : vector<8x32xf32>
    %cst_16 = arith.constant 0.353553385 : f32
    %35 = vector.broadcast %cst_16 : f32 to vector<8x32xf32>
    %36 = arith.mulf %34, %35 : vector<8x32xf32>
    %37 = arith.truncf %36 : vector<8x32xf32> to vector<8x32xbf16>
    %38 = vector.shape_cast %37 : vector<8x32xbf16> to vector<8x4x8xbf16>
    %39 = tpu.transpose %38, [1, 0, 2] : vector<8x4x8xbf16> -> vector<4x8x8xbf16>
    %c0_17 = arith.constant 0 : index
    %c0_18 = arith.constant 0 : index
    %c0_19 = arith.constant 0 : index
    %40 = vector.load %arg19[%c0_17, %c0_18, %c0_19] : memref<4x8x8xbf16, #tpu.memory_space<vmem>>, vector<4x8x8xbf16>
    "tpu.trace_start"() <{level = 10 : i32, message = "hqd,hkd->hqk"}> : () -> ()
    %cst_20 = arith.constant dense<0.000000e+00> : vector<4x8x8xf32>
    %41 = tpu.matmul %39, %40, %cst_20 {dimension_numbers = #tpu.dot_dimension_numbers<[2], [2], [1], [1], [0, 0, 0, 1, 1, 1], [0], [0]>} : vector<4x8x8xbf16>, vector<4x8x8xbf16>, vector<4x8x8xf32> -> vector<4x8x8xf32>
    "tpu.trace_stop"() : () -> ()
    %cst_21 = arith.constant dense<0xFF800000> : vector<4x8xf32>
    %42 = vector.multi_reduction <maximumf>, %41, %cst_21 [2] : vector<4x8x8xf32> to vector<4x8xf32>
    %43 = vector.shape_cast %42 : vector<4x8xf32> to vector<4x8x1xf32>
    %44 = vector.broadcast %43 : vector<4x8x1xf32> to vector<4x8x8xf32>
    %45 = arith.subf %41, %44 : vector<4x8x8xf32>
    %46 = math.exp %45 : vector<4x8x8xf32>
    %cst_22 = arith.constant dense<0.000000e+00> : vector<4x8xf32>
    %47 = vector.multi_reduction <add>, %46, %cst_22 [2] : vector<4x8x8xf32> to vector<4x8xf32>
    %48 = vector.shape_cast %47 : vector<4x8xf32> to vector<4x8x1xf32>
    %49 = vector.broadcast %48 : vector<4x8x1xf32> to vector<4x8x8xf32>
    %50 = arith.divf %46, %49 : vector<4x8x8xf32>
    %51 = arith.truncf %50 : vector<4x8x8xf32> to vector<4x8x8xbf16>
    %c0_23 = arith.constant 0 : index
    %c0_24 = arith.constant 0 : index
    %c0_25 = arith.constant 0 : index
    %52 = vector.load %arg20[%c0_23, %c0_24, %c0_25] : memref<4x8x8xbf16, #tpu.memory_space<vmem>>, vector<4x8x8xbf16>
    "tpu.trace_start"() <{level = 10 : i32, message = "hqk,hkd->hqd"}> : () -> ()
    %cst_26 = arith.constant dense<0.000000e+00> : vector<4x8x8xf32>
    %53 = tpu.matmul %51, %52, %cst_26 {dimension_numbers = #tpu.dot_dimension_numbers<[2], [1], [1], [2], [0, 0, 0, 1, 1, 2], [0], [0]>} : vector<4x8x8xbf16>, vector<4x8x8xbf16>, vector<4x8x8xf32> -> vector<4x8x8xf32>
    "tpu.trace_stop"() : () -> ()
    %54 = tpu.transpose %53, [1, 0, 2] : vector<4x8x8xf32> -> vector<8x4x8xf32>
    %55 = vector.shape_cast %54 : vector<8x4x8xf32> to vector<8x32xf32>
    %56 = arith.truncf %55 : vector<8x32xf32> to vector<8x32xbf16>
    %c0_27 = arith.constant 0 : index
    %c0_28 = arith.constant 0 : index
    %57 = vector.load %arg10[%c0_27, %c0_28] : memref<32x32xbf16, #tpu.memory_space<vmem>>, vector<32x32xbf16>
    %cst_29 = arith.constant dense<0.000000e+00> : vector<8x32xf32>
    %58 = tpu.matmul %56, %57, %cst_29 {dimension_numbers = #tpu.dot_dimension_numbers<[1], [0], [0], [1], [0, 0, 1, 1], [], []>} : vector<8x32xbf16>, vector<32x32xbf16>, vector<8x32xf32> -> vector<8x32xf32>
    %c0_30 = arith.constant 0 : index
    %c0_31 = arith.constant 0 : index
    %59 = vector.load %arg11[%c0_30, %c0_31] : memref<1x32xf32, #tpu.memory_space<vmem>>, vector<1x32xf32>
    %60 = vector.broadcast %59 : vector<1x32xf32> to vector<8x32xf32>
    %61 = arith.addf %58, %60 : vector<8x32xf32>
    %62 = arith.addf %4, %61 : vector<8x32xf32>
    %c0_32 = arith.constant 0 : index
    %c0_33 = arith.constant 0 : index
    %63 = vector.load %arg12[%c0_32, %c0_33] : memref<1x32xf32, #tpu.memory_space<vmem>>, vector<1x32xf32>
    %c0_34 = arith.constant 0 : index
    %c0_35 = arith.constant 0 : index
    %64 = vector.load %arg13[%c0_34, %c0_35] : memref<1x32xf32, #tpu.memory_space<vmem>>, vector<1x32xf32>
    %cst_36 = arith.constant dense<0.000000e+00> : vector<8xf32>
    %65 = vector.multi_reduction <add>, %62, %cst_36 [1] : vector<8x32xf32> to vector<8xf32>
    %66 = vector.shape_cast %65 : vector<8xf32> to vector<8x1xf32>
    %cst_37 = arith.constant 3.200000e+01 : f32
    %67 = vector.broadcast %cst_37 : f32 to vector<8x1xf32>
    %68 = arith.divf %66, %67 : vector<8x1xf32>
    %69 = vector.broadcast %68 : vector<8x1xf32> to vector<8x32xf32>
    %70 = arith.subf %62, %69 : vector<8x32xf32>
    %71 = arith.mulf %70, %70 : vector<8x32xf32>
    %cst_38 = arith.constant dense<0.000000e+00> : vector<8xf32>
    %72 = vector.multi_reduction <add>, %71, %cst_38 [1] : vector<8x32xf32> to vector<8xf32>
    %73 = vector.shape_cast %72 : vector<8xf32> to vector<8x1xf32>
    %cst_39 = arith.constant 3.200000e+01 : f32
    %74 = vector.broadcast %cst_39 : f32 to vector<8x1xf32>
    %75 = arith.divf %73, %74 : vector<8x1xf32>
    %76 = vector.broadcast %68 : vector<8x1xf32> to vector<8x32xf32>
    %77 = arith.subf %62, %76 : vector<8x32xf32>
    %cst_40 = arith.constant 9.99999974E-6 : f32
    %78 = vector.broadcast %cst_40 : f32 to vector<8x1xf32>
    %79 = arith.addf %75, %78 : vector<8x1xf32>
    %80 = math.rsqrt %79 : vector<8x1xf32>
    %81 = vector.broadcast %80 : vector<8x1xf32> to vector<8x32xf32>
    %82 = arith.mulf %77, %81 : vector<8x32xf32>
    %83 = vector.broadcast %63 : vector<1x32xf32> to vector<8x32xf32>
    %84 = arith.mulf %82, %83 : vector<8x32xf32>
    %85 = vector.broadcast %64 : vector<1x32xf32> to vector<8x32xf32>
    %86 = arith.addf %84, %85 : vector<8x32xf32>
    %87 = arith.truncf %86 : vector<8x32xf32> to vector<8x32xbf16>
    %c0_41 = arith.constant 0 : index
    %c0_42 = arith.constant 0 : index
    %88 = vector.load %arg14[%c0_41, %c0_42] : memref<32x32xbf16, #tpu.memory_space<vmem>>, vector<32x32xbf16>
    %cst_43 = arith.constant dense<0.000000e+00> : vector<8x32xf32>
    %89 = tpu.matmul %87, %88, %cst_43 {dimension_numbers = #tpu.dot_dimension_numbers<[1], [0], [0], [1], [0, 0, 1, 1], [], []>} : vector<8x32xbf16>, vector<32x32xbf16>, vector<8x32xf32> -> vector<8x32xf32>
    %c0_44 = arith.constant 0 : index
    %c0_45 = arith.constant 0 : index
    %90 = vector.load %arg15[%c0_44, %c0_45] : memref<1x32xf32, #tpu.memory_space<vmem>>, vector<1x32xf32>
    %91 = vector.broadcast %90 : vector<1x32xf32> to vector<8x32xf32>
    %92 = arith.addf %89, %91 : vector<8x32xf32>
    %cst_46 = arith.constant 1.702000e+00 : f32
    %93 = vector.broadcast %cst_46 : f32 to vector<8x32xf32>
    %94 = arith.mulf %93, %92 : vector<8x32xf32>
    %95 = arith.negf %94 : vector<8x32xf32>
    %96 = math.exp %95 : vector<8x32xf32>
    %cst_47 = arith.constant 1.000000e+00 : f32
    %97 = vector.broadcast %cst_47 : f32 to vector<8x32xf32>
    %98 = arith.addf %97, %96 : vector<8x32xf32>
    %99 = arith.divf %97, %98 : vector<8x32xf32>
    %100 = arith.mulf %92, %99 : vector<8x32xf32>
    %101 = arith.truncf %100 : vector<8x32xf32> to vector<8x32xbf16>
    %c0_48 = arith.constant 0 : index
    %c0_49 = arith.constant 0 : index
    %102 = vector.load %arg16[%c0_48, %c0_49] : memref<32x32xbf16, #tpu.memory_space<vmem>>, vector<32x32xbf16>
    %cst_50 = arith.constant dense<0.000000e+00> : vector<8x32xf32>
    %103 = tpu.matmul %101, %102, %cst_50 {dimension_numbers = #tpu.dot_dimension_numbers<[1], [0], [0], [1], [0, 0, 1, 1], [], []>} : vector<8x32xbf16>, vector<32x32xbf16>, vector<8x32xf32> -> vector<8x32xf32>
    %c0_51 = arith.constant 0 : index
    %c0_52 = arith.constant 0 : index
    %104 = vector.load %arg17[%c0_51, %c0_52] : memref<1x32xf32, #tpu.memory_space<vmem>>, vector<1x32xf32>
    %105 = vector.broadcast %104 : vector<1x32xf32> to vector<8x32xf32>
    %106 = arith.addf %103, %105 : vector<8x32xf32>
    %107 = arith.addf %62, %106 : vector<8x32xf32>
    %c0_53 = arith.constant 0 : index
    %c0_54 = arith.constant 0 : index
    %c0_55 = arith.constant 0 : index
    %108 = vector.load %arg18[%c0_53, %c0_54, %c0_55] : memref<1x8x32xf32, #tpu.memory_space<vmem>>, vector<1x8x32xf32>
    %109 = vector.shape_cast %108 : vector<1x8x32xf32> to vector<8x32xf32>
    %110 = vector.shape_cast %107 : vector<8x32xf32> to vector<1x8x32xf32>
    tpu.vector_store %arg18[%c0_53, %c0_54, %c0_55], %110 {strides = array<i32>} : memref<1x8x32xf32, #tpu.memory_space<vmem>>, vector<1x8x32xf32>,
    return
  }
  func.func @transform_0(%arg0: i32, %arg1: i32) -> (i32, i32, i32) {
    %c0_i32 = arith.constant 0 : i32
    %c0_i32_0 = arith.constant 0 : i32
    return %arg0, %arg1, %c0_i32 : i32, i32, i32
  }
  func.func @transform_1(%arg0: i32, %arg1: i32) -> (i32, i32, i32) {
    %c0_i32 = arith.constant 0 : i32
    %c0_i32_0 = arith.constant 0 : i32
    %c0_i32_1 = arith.constant 0 : i32
    return %arg0, %c0_i32, %c0_i32_0 : i32, i32, i32
  }
  func.func @transform_2(%arg0: i32, %arg1: i32) -> (i32, i32) {
    %c0_i32 = arith.constant 0 : i32
    %c0_i32_0 = arith.constant 0 : i32
    %c0_i32_1 = arith.constant 0 : i32
    return %c0_i32, %c0_i32_0 : i32, i32
  }
  func.func @transform_3(%arg0: i32, %arg1: i32) -> (i32, i32) {
    %c0_i32 = arith.constant 0 : i32
    %c0_i32_0 = arith.constant 0 : i32
    %c0_i32_1 = arith.constant 0 : i32
    return %c0_i32, %c0_i32_0 : i32, i32
  }
  func.func @transform_4(%arg0: i32, %arg1: i32) -> (i32, i32) {
    %c0_i32 = arith.constant 0 : i32
    %c0_i32_0 = arith.constant 0 : i32
    %c0_i32_1 = arith.constant 0 : i32
    return %c0_i32, %c0_i32_0 : i32, i32
  }
  func.func @transform_5(%arg0: i32, %arg1: i32) -> (i32, i32) {
    %c0_i32 = arith.constant 0 : i32
    %c0_i32_0 = arith.constant 0 : i32
    %c0_i32_1 = arith.constant 0 : i32
    return %c0_i32, %c0_i32_0 : i32, i32
  }
  func.func @transform_6(%arg0: i32, %arg1: i32) -> (i32, i32) {
    %c0_i32 = arith.constant 0 : i32
    %c0_i32_0 = arith.constant 0 : i32
    %c0_i32_1 = arith.constant 0 : i32
    return %c0_i32, %c0_i32_0 : i32, i32
  }
  func.func @transform_7(%arg0: i32, %arg1: i32) -> (i32, i32) {
    %c0_i32 = arith.constant 0 : i32
    %c0_i32_0 = arith.constant 0 : i32
    %c0_i32_1 = arith.constant 0 : i32
    return %c0_i32, %c0_i32_0 : i32, i32
  }
  func.func @transform_8(%arg0: i32, %arg1: i32) -> (i32, i32) {
    %c0_i32 = arith.constant 0 : i32
    %c0_i32_0 = arith.constant 0 : i32
    %c0_i32_1 = arith.constant 0 : i32
    return %c0_i32, %c0_i32_0 : i32, i32
  }
  func.func @transform_9(%arg0: i32, %arg1: i32) -> (i32, i32) {
    %c0_i32 = arith.constant 0 : i32
    %c0_i32_0 = arith.constant 0 : i32
    %c0_i32_1 = arith.constant 0 : i32
    return %c0_i32, %c0_i32_0 : i32, i32
  }
  func.func @transform_10(%arg0: i32, %arg1: i32) -> (i32, i32) {
    %c0_i32 = arith.constant 0 : i32
    %c0_i32_0 = arith.constant 0 : i32
    %c0_i32_1 = arith.constant 0 : i32
    return %c0_i32, %c0_i32_0 : i32, i32
  }
  func.func @transform_11(%arg0: i32, %arg1: i32) -> (i32, i32) {
    %c0_i32 = arith.constant 0 : i32
    %c0_i32_0 = arith.constant 0 : i32
    %c0_i32_1 = arith.constant 0 : i32
    return %c0_i32, %c0_i32_0 : i32, i32
  }
  func.func @transform_12(%arg0: i32, %arg1: i32) -> (i32, i32) {
    %c0_i32 = arith.constant 0 : i32
    %c0_i32_0 = arith.constant 0 : i32
    %c0_i32_1 = arith.constant 0 : i32
    return %c0_i32, %c0_i32_0 : i32, i32
  }
  func.func @transform_13(%arg0: i32, %arg1: i32) -> (i32, i32) {
    %c0_i32 = arith.constant 0 : i32
    %c0_i32_0 = arith.constant 0 : i32
    %c0_i32_1 = arith.constant 0 : i32
    return %c0_i32, %c0_i32_0 : i32, i32
  }
  func.func @transform_14(%arg0: i32, %arg1: i32) -> (i32, i32) {
    %c0_i32 = arith.constant 0 : i32
    %c0_i32_0 = arith.constant 0 : i32
    %c0_i32_1 = arith.constant 0 : i32
    return %c0_i32, %c0_i32_0 : i32, i32
  }
  func.func @transform_15(%arg0: i32, %arg1: i32) -> (i32, i32) {
    %c0_i32 = arith.constant 0 : i32
    %c0_i32_0 = arith.constant 0 : i32
    %c0_i32_1 = arith.constant 0 : i32
    return %c0_i32, %c0_i32_0 : i32, i32
  }
  func.func @transform_16(%arg0: i32, %arg1: i32) -> (i32, i32, i32) {
    %c0_i32 = arith.constant 0 : i32
    %c0_i32_0 = arith.constant 0 : i32
    return %arg0, %arg1, %c0_i32 : i32, i32, i32
  }
}

</mosaic_0001>

<bundles_post_ra>
// kernel: tpu_custom_call.1
= control target key start
LH: loop header
LB: loop body
LE: loop exit
PB: predicated region body
PF: predicated region fallthrough
CT: control target
= control target key end

     0   :  { %s3080_s0 = inlined_call_operand.hbm [shape: f32[2,8,32], index: 0, kind: input, shape index: {}]   ;;  %s3081_s1 = inlined_call_operand.hbm [shape: bf16[2,8,32], index: 1, kind: input, shape index: {}]   ;;  %s3082_s2 = inlined_call_operand.vmem [shape: f32[1,32], index: 2, kind: input, shape index: {}]   ;;  %s3083_s3 = inlined_call_operand.vmem [shape: f32[1,32], index: 3, kind: input, shape index: {}]   ;;  %s3084_s4 = inlined_call_operand.hbm [shape: bf16[32,32], index: 4, kind: input, shape index: {}]   ;;  %s3085_s5 = inlined_call_operand.vmem [shape: f32[1,32], index: 5, kind: input, shape index: {}]   ;;  %s3086_s6 = inlined_call_operand.hbm [shape: bf16[32,64], index: 6, kind: input, shape index: {}]   ;;  %s3087_s7 = inlined_call_operand.vmem [shape: f32[1,64], index: 7, kind: input, shape index: {}]   ;;  %s3088_s8 = inlined_call_operand.hbm [shape: bf16[32,32], index: 8, kind: input, shape index: {}]   ;;  %s3089_s9 = inlined_call_operand.vmem [shape: f32[1,32], index: 9, kind: input, shape index: {}]   ;;  %s3090_s10 = inlined_call_operand.vmem [shape: f32[1,32], index: 10, kind: input, shape index: {}]   ;;  %s3091_s11 = inlined_call_operand.vmem [shape: f32[1,32], index: 11, kind: input, shape index: {}]   ;;  %s3092_s12 = inlined_call_operand.hbm [shape: bf16[32,32], index: 12, kind: input, shape index: {}]   ;;  %s3093_s13 = inlined_call_operand.vmem [shape: f32[1,32], index: 13, kind: input, shape index: {}]   ;;  %s3094_s14 = inlined_call_operand.hbm [shape: bf16[32,32], index: 14, kind: input, shape index: {}]   ;;  %s3095_s15 = inlined_call_operand.vmem [shape: f32[1,32], index: 15, kind: input, shape index: {}]   ;;  %s3096_s16 = inlined_call_operand.hbm [shape: f32[2,8,32], index: 16, kind: output, shape index: {}]  }
   0x1   :  { %3104 = sst [smem:[#allocation30_spill]] %s3080_s0 }
   0x2   :  { %3105 = sst [smem:[#allocation31_spill]] %s3084_s4 }
   0x3   :  { %3106 = sst [smem:[#allocation32_spill]] %s3086_s6 }
   0x4   :  { %3107 = sst [smem:[#allocation33_spill]] %s3088_s8 }
   0x5   :  { %3108 = sst [smem:[#allocation34_spill]] %s3089_s9 }
   0x6   :  { %3109 = sst [smem:[#allocation35_spill]] %s3090_s10 }
   0x7   :  { %3110 = sst [smem:[#allocation36_spill]] %s3091_s11 }
   0x8   :  { %3111 = sst [smem:[#allocation37_spill]] %s3092_s12 }
   0x9   :  { %3112 = sst [smem:[#allocation38_spill]] %s3093_s13 }
   0xa   :  { %3113 = sst [smem:[#allocation39_spill]] %s3094_s14 }
   0xb   :  { %3114 = sst [smem:[#allocation40_spill]] %s3095_s15 }
   0xc   :  { %3115 = sst [smem:[#allocation41_spill]] %s3096_s16 }
   0xd   :  { %21 = vsyncpa [#allocation5], 0 }
   0xe   :  { %23 = vsyncpa [#allocation5 + $0x1], 0 }
   0xf   :  { %24 = vsyncpa [#allocation8], 0 }
  0x10   :  { %26 = vsyncpa [#allocation8 + $0x1], 0 }
  0x11   :  { %27 = vsyncpa [#allocation11], 0 }
  0x12   :  { %28 = vsyncpa [#allocation14], 0 }
  0x13   :  { %29 = vsyncpa [#allocation6], 0 }
  0x14   :  { %31 = vsyncpa [#allocation6 + $0x1], 0  ;;  %s2621_s21 = smov 0   ;;  %s2623_s22 = smov 0  }
  0x15   :  { %s2625_s23 = smov 0   ;;  %s2627_s24 = smov 0  }
  0x16   :  { %s2629_s25 = smov 0   ;;  %s2631_s26 = smov 0  }
  0x17 LB: > { %3116 = sst [smem:[#allocation23_spill]] %s2497_s21  ;;  %s2652_s27 = sadd.s32 4294967295, %s2517_s26   ;;  %s2517_s26 = sphi %s2631_s26, %s37_s26   ;;  %s2513_s25 = sphi %s2629_s25, %s3152_s25   ;;  %s2509_s24 = sphi %s2627_s24, %s3151_s24   ;;  %s2505_s23 = sphi %s2625_s23, %s3147_s23   ;;  %s2501_s22 = sphi %s2623_s22, %s3150_s22   ;;  %s2497_s21 = sphi %s2621_s21, %s3149_s21  }
  0x18   : > { %3117 = sst [smem:[#allocation24_spill]] %s2505_s23  ;;  %p1951_p0 = scmp.ge.s32.totalorder %s2517_s26, 1 }
  0x19   : > { %3118 = sst [smem:[#allocation25_spill]] %s2509_s24  ;;  %p72_p1 = scmp.eq.s32.totalorder %s2652_s27, 0 }
  0x1a   : > { %p430_p2 = scmp.lt.s32.totalorder %s2517_s26, 3  ;;  %s3119_s4 = sld [smem:[#allocation31_spill]] }
  0x1b   : > { %s2519_s17 = smov [#allocation9]   ;;  %p1957_p6 = scmp.ge.s32.totalorder %s2517_s26, 2 }
  0x1c   : > { %p2660_p3 = pnand %p1951_p0, %p430_p2  ;;  %s449_s18 = sshll.u32 %s2519_s17, 4  ;;  %s450_s18 = int_to_ptr.vmem [resolvable:$true] %s449_s18 }
  0x1d   : > { %s3122_s6 = sld [smem:[#allocation32_spill]]  ;;  %s2521_s16 = smov 4  }
  0x1e   : > { %p2065_p4 = pneg %p2660_p3  ;;  %s2522_s17 = smov [#allocation10]  }
  0x1f   : > { %s466_s15 = sshll.u32 %s2522_s17, 4  ;;  %s3123_s12 = sld [smem:[#allocation37_spill]]  ;;  %s467_s15 = int_to_ptr.vmem [resolvable:$true] %s466_s15 }
  0x20   : > { %s447_s30 = sshll.u32 %s3119_s4, 4  ;;  %p2668_p5 = pnand %p2065_p4, %p72_p1  ;;  %s448_s30 = int_to_ptr.hbm [resolvable:$true] %s447_s30 }
  0x21   : > { %s2520_s4 = smov 64   ;;  %s3124_s8 = sld [smem:[#allocation33_spill]] }
  0x22   : > { %2068 = dma.hbm_to_vmem [thread:$0]  (!%p2668_p5), %s448_s30, 256, %s450_s18, [#allocation8], %s2520_s4, %s2520_s4, %s2521_s16  }
  0x23   : > { %s464_s29 = sshll.u32 %s3122_s6, 4  ;;  %s2523_s6 = smov [#allocation13]   ;;  %s465_s29 = int_to_ptr.hbm [resolvable:$true] %s464_s29 }
  0x24   : > { %2071 = dma.hbm_to_vmem [thread:$0]  (!%p2668_p5), %s465_s29, 256, %s467_s15, [#allocation11], %s2520_s4, %s2520_s4, %s2521_s16  }
  0x25   : > { %s504_s11 = sshll.u32 %s3123_s12, 4  ;;  %s506_s30 = sshll.u32 %s2523_s6, 4  ;;  %s505_s11 = int_to_ptr.hbm [resolvable:$true] %s504_s11  ;;  %s507_s30 = int_to_ptr.vmem [resolvable:$true] %s506_s30 }
  0x26   : > { %2077 = dma.hbm_to_vmem [thread:$0]  (!%p2668_p5), %s505_s11, 256, %s507_s30, [#allocation14], %s2520_s4, %s2520_s4, %s2521_s16  }
  0x27   : > { %s481_s28 = sshll.u32 %s3124_s8, 4  ;;  %s2524_s13 = smov [#allocation12]   ;;  %s482_s28 = int_to_ptr.hbm [resolvable:$true] %s481_s28 }
  0x28   : > { %s483_s15 = sshll.u32 %s2524_s13, 4  ;;  %s3125_s14 = sld [smem:[#allocation39_spill]]  ;;  %s484_s15 = int_to_ptr.vmem [resolvable:$true] %s483_s15 }
  0x29   : > { %2074 = dma.hbm_to_vmem [thread:$0]  (!%p2668_p5), %s482_s28, 256, %s484_s15, [#allocation11], %s2520_s4, %s2520_s4, %s2521_s16  }
  0x2a   : > { %s2525_s6 = smov [#allocation15]   ;;  %s1950_s11 = sadd.s32 4294967294, %s2517_s26  }
  0x2b   : > { %s523_s29 = sshll.u32 %s2525_s6, 4  ;;  %s49_s17 = sadd.s32 1, %s2513_s25  ;;  %s524_s29 = int_to_ptr.vmem [resolvable:$true] %s523_s29 }
  0x2c   : > { %s58_s20 = sadd.s32 1, %s2505_s23  ;;  %p51_p7 = scmp.ge.s32.totalorder %s49_s17, 2 }
  0x2d   : > { %p65_p8 = scmp.ne.s32.totalorder %s2505_s23, %s2501_s22  ;;  %p66_p9 = scmp.eq.s32.totalorder %s2517_s26, 0 }
  0x2e   : > { %s521_s18 = sshll.u32 %s3125_s14, 4  ;;  %p71_p10 = scmp.ne.s32.totalorder %s2501_s22, %s2497_s21  ;;  %s522_s18 = int_to_ptr.hbm [resolvable:$true] %s521_s18 }
  0x2f   : > { %2080 = dma.hbm_to_vmem [thread:$0]  (!%p2668_p5), %s522_s18, 256, %s524_s29, [#allocation14], %s2520_s4, %s2520_s4, %s2521_s16  }
  0x30   : > { %s3154_s17 = smov (%p51_p7, %s49_s17), 0  ;;  %p2705_p11 = por %p66_p9, %p65_p8 }
  0x31   : > { %3126 = sst [smem:[#allocation26_spill]] %s3154_s17  ;;  %p2711_p12 = por %p72_p1, %p71_p10 }
  0x32   : > { %s53_s16 = ssub.s32 %s2513_s25, %s3154_s17  ;;  %p417_p13 = scmp.eq.s32.totalorder %s2652_s27, 1 }
  0x33   : > { %p56_p0 = scmp.eq.s32.totalorder %s53_s16, 0  ;;  %p423_p2 = scmp.eq.s32.totalorder %s1950_s11, 1 }
  0x34   : > { %p2718_p4 = por %p417_p13, %p65_p8  ;;  %p2097_p5 = scmp.lt.s32.totalorder %s2517_s26, 2 }
  0x35   : > { %s2724_s30 = scalar_select %p56_p0, %s2505_s23, %s58_s20  }
  0x36   : > { %s3129_s19 = scalar_select %p2718_p4, 1, 0 }
  0x37   : > { %3131 = sst [smem:[#allocation28_spill]] %s2724_s30  ;;  %p2726_p7 = por %p423_p2, %p71_p10 }
  0x38   : > { %3130 = sst [smem:[#allocation27_spill]] %s3129_s19  ;;  %s540_s15 = sand.u32 1, %s2505_s23  }
  0x39   : > { %s3132_s13 = scalar_select %p2726_p7, 1, 0 }
  0x3a   : > { %s1958_s24 = sshll.u32 %s540_s15, 3  ;;  %s1959_s10 = sshll.u32 %s2513_s25, 3 }
  0x3b   : > { %3133 = sst [smem:[#allocation29_spill]] %s3132_s13  ;;  %s544_s11 = scalar_lea.vmem [#allocation4], %s1958_s24 }
  0x3c   : > { %s3134_s29 = sld [smem:[#allocation30_spill]]  ;;  %s553_s8 = sshll.u32 %s544_s11, 4  ;;  %s554_s8 = int_to_ptr.vmem [resolvable:$true] %s553_s8 }
  0x3d   : > { %p2082_p8 = pnand %p2097_p5, %p2705_p11  ;;  %s560_s20 = sand.u32 1, %s2517_s26  }
  0x3e   : > { %s1960_s14 = sshll.u32 %s540_s15, 2  ;;  %s541_s17 = scalar_lea.sflag [#allocation5], %s540_s15 }
  0x3f   : > { %s1961_s30 = sshll.u32 %s2513_s25, 2  ;;  %s564_s19 = scalar_lea.vmem [#allocation7], %s1960_s14 }
  0x40   : > { %s568_s21 = scalar_lea.hbm %s3081_s1, %s1961_s30  ;;  %s572_s9 = sshll.u32 %s564_s19, 4  ;;  %s573_s9 = int_to_ptr.vmem [resolvable:$true] %s572_s9 }
  0x41   : > { %s570_s18 = sshll.u32 %s568_s21, 4  ;;  %s561_s24 = scalar_lea.sflag [#allocation8], %s560_s20  ;;  %s571_s18 = int_to_ptr.hbm [resolvable:$true] %s570_s18 }
  0x42   : > { %s549_s16 = scalar_lea.hbm %s3134_s29, %s1959_s10  ;;  %581 = sbr.rel (%p2660_p3) target bundleno = 2031 (0x7ef), region = 84 }
  0x43   : > { %s551_s12 = sshll.u32 %s549_s16, 4  ;;  %s2745_s28 = sand.u32 (!%p2660_p3), 1, %s2501_s22   ;;  %s552_s12 = int_to_ptr.hbm [resolvable:$true] %s551_s12 }
  0x44   : > { %2084 = dma.hbm_to_vmem [thread:$0]  (!%p2082_p8), %s552_s12, 128, %s554_s8, %s541_s17  }
  0x45   : > { %2087 = dma.hbm_to_vmem [thread:$0]  (!%p2082_p8), %s571_s18, 64, %s573_s9, %s561_s24  }
  0x46   : > { %s1963_s8 = sshll.u32 (!%p2660_p3), %s2745_s28, 3  ;;  %s584_s12 = scalar_lea.sflag (!%p2660_p3), [#allocation5], %s2745_s28 }
  0x47   : > { %s2751_s14 = scalar_lea.vmem [#allocation4], %s1963_s8 }
  0x48   : > { %2472 = dma.done.wait (%p2711_p12), %s584_s12, 128  }
  0x49   : > { %2474 = vsyncadd (%p2711_p12), %s584_s12, 4294967168  ;;  %s593_s9 = sand.u32 1, %s2652_s27   ;;  %s1964_s21 = sshll.u32 %s2745_s28, 2 }
  0x4a   : > { %s594_s23 = scalar_lea.sflag [#allocation8], %s593_s9  ;;  %s597_s0 = scalar_lea.vmem [#allocation7], %s1964_s21 }
  0x4b   : > { %2476 = dma.done.wait (%p2711_p12), %s594_s23, 64  }
  0x4c   : > { %2478 = vsyncadd (%p2711_p12), %s594_s23, 4294967232 }
  0x4d   : > { %2480 = dma.done.wait (%p72_p1), [#allocation8], 256  }
  0x4e   : > { %2482 = vsyncadd (%p72_p1), [#allocation8], 4294967040 }
  0x4f   : > { %2484 = dma.done.wait (%p72_p1), [#allocation11], 512  }
  0x50   : > { %2486 = vsyncadd (%p72_p1), [#allocation11], 4294966784 }
  0x51   : > { %2488 = dma.done.wait (%p72_p1), [#allocation14], 512  }
  0x52   : > { %2490 = vsyncadd (%p72_p1), [#allocation14], 4294966784  ;;  %v682_v0 = vld [vmem:[%s597_s0] sm:$0xf]  ;;  %vm686_vm0 = vcmask 261120   ;;  %v1023_v3 = vld [vmem:[%s2751_s14] sm:$0xff] }
  0x53   : > { %v683_v1 = vunpack.c.l.bf16 %v682_v0  ;;  %v1027_v4 = vsel %vm686_vm0, %v1023_v3, 0.0  ;;  %v2526_v5 = vmov 32.0   ;;  %v2030_v22 = vld [vmem:[#allocation10 + $0x8] sm:$0xff]  ;;  %v2029_v23 = vld [vmem:[#allocation10] sm:$0xff]  ;;  %v2032_v24 = vld [vmem:[#allocation9 + $0x8] sm:$0xff]  ;;  %s2527_s16 = smov 104  }
  0x54   : > { %2180 = vrcp.f32 %v2526_v5  ;;  %754 = vmatpush.bf16.msra.mxu0 %v2030_v22  ;;  %1094 = vmatpush.bf16.msra.mxu1 %v2032_v24  ;;  %v2031_v26 = vld [vmem:[#allocation9] sm:$0xff]  ;;  %v2169_v40 = vld [vmem:[%s3082_s2] ss:$0 sm:$0xff]  ;;  %s2528_s11 = smov 120   ;;  %s2529_s24 = smov 96   ;;  %vm792_vm8 = vcmask 1047556  }
  0x55   : > { %v687_v2 = vsel %vm686_vm0, %v683_v1, 0.0  ;;  %v2170_v44 = vld [vmem:[%s3083_s3] ss:$0 sm:$0xff]  ;;  %s2530_s12 = smov 112   ;;  %vm960_vm9 = vcmask 60416   ;;  %vm1229_vm10 = vcmask 64512  }
  0x56   : > { %688 = vadd.xlane.f32.xlu0 %v687_v2  ;;  %v2171_v51 = vld [vmem:[%s3082_s2] ss:$0 sm:$0xff]  ;;  %vm1413_vm11 = vcmask 1043456   ;;  %s2533_s9 = smov 24   ;;  %s2534_s21 = smov 16  }
  0x57   : > { %v2172_v54 = vld [vmem:[%s3083_s3] ss:$0 sm:$0xff]  ;;  %s2535_s23 = smov 8   ;;  %s3135_s17 = sld [smem:[#allocation34_spill]] }
  0x58   : > { %755 = vmatpush.bf16.msra.mxu0 %v2029_v23  ;;  %1095 = vmatpush.bf16.msra.mxu1 %v2031_v26  ;;  %v2173_v58 = vld [vmem:[%s3087_s7] ss:$0 sm:$0xff]  ;;  %s3136_s19 = sld [smem:[#allocation35_spill]] }
  0x59   : > { %v2174_v62 = vld [vmem:[%s3085_s5] ss:$0 sm:$0xff]  ;;  %s3137_s15 = sld [smem:[#allocation36_spill]] }
  0x5a   : > { %v2181_v6 = vpop.eup %2180  ;;  %s3138_s29 = sld [smem:[#allocation38_spill]] }
  0x5b   : > { %v691_v7 = vmul.f32 32.0, %v2181_v6  ;;  %vm695_vm1 = vweird.f32 %v2181_v6 }
  0x5d   : > { %v692_v8 = vsub.f32 1.0, %v691_v7  ;;  %v2531_v7 = vmov 1983009808  }
  0x5e   : > { %1028 = vadd.xlane.f32.xlu0 %v1027_v4 }
  0x5f   : > { %v693_v9 = vmul.f32 %v2181_v6, %v692_v8  ;;  %v783_v8 = vunpack.c.l.s4 %v2531_v7 }
  0x61   : > { %v694_v10 = vadd.f32 %v2181_v6, %v693_v9 }
  0x63   : > { %v2778_v11 = vsel %vm695_vm1, %v2181_v6, %v694_v10 }
  0xc9   : > { %v689_v12 = vpop.xlane.xlu0 %688 }
  0xca   : > { %v697_v13 = vmul.f32 %v2778_v11, %v689_v12  ;;  %v2817_v12 = vunpack.c.0.s8 %v783_v8 }
  0xcc   : > { %v698_v14 = vsub.f32 %v683_v1, %v697_v13 }
  0xce   : > { %v699_v15 = vmul.f32 %v698_v14, %v698_v14 }
  0xd0   : > { %v700_v16 = vsel %vm686_vm0, %v699_v15, 0.0 }
  0xd1   : > { %701 = vadd.xlane.f32.xlu1 %v700_v16  ;;  %v1029_v17 = vpop.xlane.xlu0 %1028  ;;  %v2532_v16 = vmov 1934713408  }
  0xd2   : > { %v1037_v18 = vmul.f32 %v1029_v17, %v2778_v11  ;;  %v797_v17 = vunpack.c.l.s4 %v2532_v16 }
  0xd4   : > { %v1038_v19 = vsub.f32 %v1023_v3, %v1037_v18 }
  0xd6   : > { %v1039_v20 = vmul.f32 %v1038_v19, %v1038_v19 }
  0xd8   : > { %v1040_v21 = vsel %vm686_vm0, %v1039_v20, 0.0 }
  0xd9   : > { %1041 = vadd.xlane.f32.xlu1 %v1040_v21 }
 0x144   : > { %v702_v25 = vpop.xlane.xlu1 %701 }
 0x145   : > { %v703_v27 = vmul.f32 %v702_v25, %v2778_v11  ;;  %v2828_v25 = vunpack.c.0.s8 %v797_v17 }
 0x147   : > { %v704_v28 = vadd.f32 1e-05, %v703_v27 }
 0x149   : > { %2182 = vrsqrt.f32 %v704_v28  ;;  %vm711_vm3 = vweird.f32 %v704_v28 }
 0x14c   : > { %v1042_v29 = vpop.xlane.xlu1 %1041 }
 0x14d   : > { %v1043_v30 = vmul.f32 %v1042_v29, %v2778_v11 }
 0x14f   : > { %v2183_v31 = vpop.eup %2182  ;;  %v1044_v32 = vadd.f32 1e-05, %v1043_v30 }
 0x150   : > { %v706_v33 = vmul.f32 %v2183_v31, %v704_v28  ;;  %vm712_vm2 = vweird.f32 %v2183_v31 }
 0x151   : > { %2184 = vrsqrt.f32 %v1044_v32  ;;  %vm713_vm4 = vmor %vm711_vm3, %vm712_vm2  ;;  %vm1051_vm6 = vweird.f32 %v1044_v32 }
 0x152   : > { %v707_v34 = vmul.f32 %v2183_v31, %v706_v33 }
 0x154   : > { %v708_v35 = vmul.f32 0.5, %v707_v34 }
 0x156   : > { %v709_v36 = vsub.f32 1.5, %v708_v35 }
 0x157   : > { %v2185_v37 = vpop.eup %2184 }
 0x158   : > { %v710_v38 = vmul.f32 %v2183_v31, %v709_v36  ;;  %v1046_v39 = vmul.f32 %v2185_v37, %v1044_v32  ;;  %vm1052_vm5 = vweird.f32 %v2185_v37 }
 0x159   : > { %vm1053_vm7 = vmor %vm1051_vm6, %vm1052_vm5 }
 0x15a   : > { %v714_v41 = vsel %vm713_vm4, %v2183_v31, %v710_v38  ;;  %v1047_v42 = vmul.f32 %v2185_v37, %v1046_v39 }
 0x15b   : > { %v715_v43 = vmul.f32 %v714_v41, %v698_v14 }
 0x15c   : > { %v1048_v45 = vmul.f32 0.5, %v1047_v42 }
 0x15d   : > { %v719_v46 = vmul.f32 %v2169_v40, %v715_v43 }
 0x15e   : > { %v1049_v47 = vsub.f32 1.5, %v1048_v45 }
 0x15f   : > { %v723_v48 = vadd.f32 %v2170_v44, %v719_v46 }
 0x160   : > { %v1050_v49 = vmul.f32 %v2185_v37, %v1049_v47 }
 0x161   : > { %v724_v50 = vpack.c.bf16 %v723_v48, %v723_v48 }
 0x162   : > { %v1054_v52 = vsel %vm1053_vm7, %v2185_v37, %v1050_v49 }
 0x163   : > { %1979 = vmatmul.msk.bf16.vlgmr.msra.gmra.mxu0 %vm686_vm0, %v724_v50  ;;  %v1055_v53 = vmul.f32 %v1054_v52, %v1038_v19 }
 0x165   : > { %v1059_v55 = vmul.f32 %v2171_v51, %v1055_v53 }
 0x167   : > { %v1063_v56 = vadd.f32 %v2172_v54, %v1059_v55 }
 0x169   : > { %v1064_v57 = vpack.c.bf16 %v1063_v56, %v1063_v56 }
 0x16b   : > { %1988 = vmatmul.msk.bf16.vlgmr.msra.gmra.mxu1 %vm686_vm0, %v1064_v57 }
 0x1e0   : > { %v757_v59 = vpop.f32.mrf.mxu0 }
 0x1e1   : > { %v758_v60 = vadd.f32 %v2173_v58, %v757_v59 }
 0x1e3   : > { %v761_v61 = vpack.c.bf16 %v758_v60, %v758_v60 }
 0x1e5   : > { %767 = vrot.lane.b32.xlu0 %v761_v61, %s2527_s16  ;;  %763 = vrot.lane.b32.xlu2 %v761_v61, %s2528_s11  ;;  %v772_v14 = vshrl.u32 %v761_v61, 16 }
 0x1e8   : > { %v759_v63 = vpop.f32.mrf.mxu0  ;;  %v1097_v0 = vpop.f32.mrf.mxu1 }
 0x1e9   : > { %v1098_v1 = vadd.f32 %v2174_v62, %v1097_v0 }
 0x1eb   : > { %v1101_v2 = vmul.f32 0.35355338, %v1098_v1 }
 0x1ed   : > { %v2806_v3 = vpack.c.bf16 %v1101_v2, %v1101_v2  ;;  %834 = vrot.lane.b32.xlu0 %v761_v61, %s2529_s24  ;;  %765 = vrot.lane.b32.xlu2 %v761_v61, %s2530_s12 }
 0x1ef   : > { %1104 = vrot.lane.b32.xlu1 %v2806_v3, %s2528_s11  ;;  %v1113_v55 = vshrl.u32 %v2806_v3, 16 }
 0x1f0   : > { %v1099_v4 = vpop.f32.mrf.mxu1 }
 0x1f5   : > { %1106 = vrot.lane.b32.xlu2 %v2806_v3, %s2530_s12 }
 0x1fd   : > { %1108 = vrot.lane.b32.xlu2 %v2806_v3, %s2527_s16  ;;  %s3139_s16 = sld [smem:[#allocation25_spill]] }
 0x203   : > { %s2026_s11 = sshll.u32 %s3139_s16, 3 }
 0x23f   : > { %v2812_v5 = vpop.permute.xlu2 %763 }
 0x240   : > { %v773_v10 = vshrl.u32 %v2812_v5, 16  ;;  %v771_v13 = vpack.i.b16 %v2812_v5, %v761_v61 }
 0x242   : > { %v774_v15 = vpack.i.b16 %v773_v10, %v772_v14  ;;  %v785_v18 = vperm.slane %v771_v13, %v2817_v12 }
 0x244   : > { %v812_v24 = vperm.slane %v774_v15, %v2817_v12  ;;  %v794_v26 = vrot.slane %v785_v18, 4 }
 0x246   : > { %v820_v33 = vrot.slane %v812_v24, 4 }
 0x247   : > { %v2814_v6 = vpop.permute.xlu2 %765 }
 0x248   : > { %v778_v21 = vshrl.u32 %v2814_v6, 16 }
 0x24f   : > { %v1107_v9 = vpop.permute.xlu2 %1106 }
 0x250   : > { %v1119_v30 = vshrl.u32 %v1107_v9, 16 }
 0x257   : > { %v1109_v19 = vpop.permute.xlu2 %1108  ;;  %v2821_v20 = vpop.permute.xlu0 %767 }
 0x258   : > { %v777_v22 = vpack.i.b16 %v2821_v20, %v2814_v6  ;;  %v779_v23 = vshrl.u32 %v2821_v20, 16  ;;  %v1120_v27 = vshrl.u32 %v1109_v19, 16  ;;  %v1118_v34 = vpack.i.b16 %v1109_v19, %v1107_v9 }
 0x25a   : > { %v780_v28 = vpack.i.b16 %v779_v23, %v778_v21  ;;  %v790_v29 = vperm.slane %v777_v22, %v2817_v12  ;;  %v1121_v37 = vpack.i.b16 %v1120_v27, %v1119_v30  ;;  %v1131_v44 = vperm.slane %v1118_v34, %v2817_v12 }
 0x25c   : > { %v791_v31 = vrot.slane %v790_v29, 4  ;;  %v795_v32 = vsel %vm792_vm8, %v790_v29, %v794_v26  ;;  %v817_v36 = vperm.slane %v780_v28, %v2817_v12  ;;  %v1158_v49 = vperm.slane %v1121_v37, %v2817_v12 }
 0x25d   : > { %v803_v35 = vperm.slane %v795_v32, %v2828_v25  ;;  %v1132_v1 = vrot.slane %v1131_v44, 4 }
 0x25e   : > { %v793_v38 = vsel %vm792_vm8, %v791_v31, %v785_v18  ;;  %v818_v41 = vrot.slane %v817_v36, 4  ;;  %v821_v42 = vsel %vm792_vm8, %v817_v36, %v820_v33  ;;  %v1159_v2 = vrot.slane %v1158_v49, 4 }
 0x25f   : > { %v799_v39 = vperm.slane %v793_v38, %v2828_v25  ;;  %v806_v40 = vrot.slane %v803_v35, 4  ;;  %v829_v43 = vperm.slane %v821_v42, %v2828_v25 }
 0x260   : > { %v819_v47 = vsel %vm792_vm8, %v818_v41, %v812_v24 }
 0x261   : > { %v804_v45 = vrot.slane %v799_v39, 4  ;;  %v807_v46 = vsel %vm792_vm8, 0, %v806_v40  ;;  %v1105_v48 = vpop.permute.xlu1 %1104  ;;  %v825_v50 = vperm.slane %v819_v47, %v2828_v25  ;;  %v832_v51 = vrot.slane %v829_v43, 4 }
 0x262   : > { %v911_v52 = vrot.slane %v807_v46, 4  ;;  %v1112_v54 = vpack.i.b16 %v1105_v48, %v2806_v3  ;;  %v1114_v56 = vshrl.u32 %v1105_v48, 16  ;;  %v906_v59 = vsel %vm792_vm8, %v806_v40, %v799_v39 }
 0x263   : > { %v805_v53 = vsel %vm792_vm8, 0, %v804_v45  ;;  %v830_v57 = vrot.slane %v825_v50, 4  ;;  %v833_v58 = vsel %vm792_vm8, 0, %v832_v51  ;;  %v925_v62 = vsel %vm792_vm8, %v832_v51, %v825_v50 }
 0x264   : > { %v912_v60 = vsel %vm792_vm8, %v911_v52, %v805_v53  ;;  %v930_v63 = vrot.slane %v833_v58, 4  ;;  %v1115_v0 = vpack.i.b16 %v1114_v56, %v1113_v55  ;;  %v1126_v3 = vperm.slane %v1112_v54, %v2817_v12 }
 0x265   : > { %v916_v61 = vperm.slane %v912_v60, %v2817_v12  ;;  %v831_v4 = vsel %vm792_vm8, 0, %v830_v57  ;;  %v910_v7 = vperm.slane %v906_v59, %v2817_v12  ;;  %v929_v13 = vperm.slane %v925_v62, %v2817_v12 }
 0x266   : > { %v931_v9 = vsel %vm792_vm8, %v930_v63, %v831_v4  ;;  %v1153_v10 = vperm.slane %v1115_v0, %v2817_v12  ;;  %v1134_v15 = vsel %vm792_vm8, %v1132_v1, %v1126_v3  ;;  %v1135_v16 = vrot.slane %v1126_v3, 4 }
 0x267   : > { %v917_v8 = vrot.slane %v916_v61, 4  ;;  %v935_v14 = vperm.slane %v931_v9, %v2817_v12  ;;  %v1140_v18 = vperm.slane %v1134_v15, %v2828_v25 }
 0x268   : > { %v1160_v19 = vsel %vm792_vm8, %v1159_v2, %v1153_v10  ;;  %v1161_v21 = vrot.slane %v1153_v10, 4  ;;  %v1136_v24 = vsel %vm792_vm8, %v1131_v44, %v1135_v16 }
 0x269   : > { %v918_v17 = vsel %vm792_vm8, %v917_v8, %v910_v7  ;;  %v936_v23 = vrot.slane %v935_v14, 4  ;;  %v1166_v26 = vperm.slane %v1160_v19, %v2828_v25  ;;  %v1144_v27 = vperm.slane %v1136_v24, %v2828_v25 }
 0x26a   : > { %v922_v22 = vperm.slane %v918_v17, %v2828_v25  ;;  %v1162_v28 = vsel %vm792_vm8, %v1158_v49, %v1161_v21  ;;  %v1145_v31 = vrot.slane %v1140_v18, 4 }
 0x26b   : > { %v937_v30 = vsel %vm792_vm8, %v936_v23, %v929_v13  ;;  %v1170_v32 = vperm.slane %v1162_v28, %v2828_v25  ;;  %v1147_v34 = vrot.slane %v1144_v27, 4  ;;  %v1171_v36 = vrot.slane %v1166_v26, 4 }
 0x26c   : > { %v923_v29 = vrot.slane %v922_v22, 4  ;;  %v941_v33 = vperm.slane %v937_v30, %v2828_v25  ;;  %v948_v35 = vshrl.u32 %v922_v22, 16  ;;  %v1146_v42 = vsel %vm792_vm8, 0, %v1145_v31 }
 0x26d   : > { %v1173_v37 = vrot.slane %v1170_v32, 4  ;;  %v1148_v43 = vsel %vm792_vm8, 0, %v1147_v34  ;;  %v1172_v52 = vsel %vm792_vm8, 0, %v1171_v36  ;;  %v1175_v53 = vsel %vm792_vm8, %v1147_v34, %v1140_v18 }
 0x26e   : > { %v924_v38 = vsel %vm792_vm8, 0, %v923_v29  ;;  %v942_v39 = vrot.slane %v941_v33, 4  ;;  %v946_v40 = vpack.i.b16 %v941_v33, %v922_v22  ;;  %v949_v41 = vshrl.u32 %v941_v33, 16 }
 0x26f   : > { %v1174_v44 = vsel %vm792_vm8, 0, %v1173_v37  ;;  %v1180_v47 = vrot.slane %v1148_v43, 4  ;;  %v956_v50 = vshrl.u32 %v924_v38, 16  ;;  %v1194_v55 = vsel %vm792_vm8, %v1173_v37, %v1166_v26 }
 0x270   : > { %v943_v45 = vsel %vm792_vm8, 0, %v942_v39  ;;  %v950_v46 = vpack.i.b16 %v949_v41, %v948_v35  ;;  %961 = vst.msk [vmem:[#allocation2] sm:$0xf] %vm960_vm9, %v946_v40  ;;  %v1199_v48 = vrot.slane %v1174_v44, 4  ;;  %v1179_v60 = vperm.slane %v1175_v53, %v2817_v12 }
 0x271   : > { %v954_v49 = vpack.i.b16 %v943_v45, %v924_v38  ;;  %v957_v51 = vshrl.u32 %v943_v45, 16  ;;  %v1181_v54 = vsel %vm792_vm8, %v1180_v47, %v1146_v42  ;;  %v1198_v62 = vperm.slane %v1194_v55, %v2817_v12  ;;  %v835_v42 = vpop.permute.xlu0 %834 }
 0x272   : > { %962 = vst.msk [vmem:[#allocation2 + $0x4] sm:$0xf] %vm960_vm9, %v950_v46  ;;  %v1200_v56 = vsel %vm792_vm8, %v1199_v48, %v1172_v52  ;;  %v1185_v58 = vperm.slane %v1181_v54, %v2817_v12 }
 0x273   : > { %v958_v57 = vpack.i.b16 %v957_v51, %v956_v50  ;;  %963 = vst.msk [vmem:[#allocation2 + $0x8] sm:$0xf] %vm960_vm9, %v954_v49  ;;  %v1204_v59 = vperm.slane %v1200_v56, %v2817_v12 }
 0x274   : > { %v1186_v61 = vrot.slane %v1185_v58, 4 }
 0x275   : > { %964 = vst.msk [vmem:[#allocation2 + $0xc] sm:$0xf] %vm960_vm9, %v958_v57  ;;  %v1205_v63 = vrot.slane %v1204_v59, 4  ;;  %v845_v57 = vshrl.u32 %v835_v42, 16 }
 0x276   : > { %v1187_v1 = vsel %vm792_vm8, %v1186_v61, %v1179_v60 }
 0x277   : > { %v1225_v0 = vld [vmem:[#allocation2] sm:$0xf]  ;;  %v1206_v2 = vsel %vm792_vm8, %v1205_v63, %v1198_v62  ;;  %v1191_v3 = vperm.slane %v1187_v1, %v2828_v25 }
 0x278   : > { %v1234_v4 = vsel %vm1229_vm10, %v1225_v0, 0  ;;  %v1210_v7 = vperm.slane %v1206_v2, %v2828_v25 }
 0x279   : > { %1243 = vmatpush.bf16.xpose.msra.mxu2 %v1234_v4  ;;  %v1226_v8 = vld [vmem:[#allocation2 + $0x4] sm:$0xf]  ;;  %v1192_v14 = vrot.slane %v1191_v3, 4  ;;  %v1216_v22 = vshrl.u32 %v1191_v3, 16 }
 0x27a   : > { %v1253_v9 = vsel %vm1229_vm10, %v1226_v8, 0  ;;  %v1227_v10 = vld [vmem:[#allocation2 + $0x8] sm:$0xf]  ;;  %v1211_v15 = vrot.slane %v1210_v7, 4  ;;  %v1217_v17 = vshrl.u32 %v1210_v7, 16  ;;  %v1215_v21 = vpack.i.b16 %v1210_v7, %v1191_v3 }
 0x27b   : > { %1262 = vmatpush.bf16.xpose.msra.mxu3 %v1253_v9  ;;  %v1272_v13 = vsel %vm1229_vm10, %v1227_v10, 0  ;;  %v1193_v23 = vsel %vm792_vm8, 0, %v1192_v14 }
 0x27c   : > { %1281 = vmatpush.bf16.xpose.msrb.mxu0 %v1272_v13  ;;  %v1228_v16 = vld [vmem:[#allocation2 + $0xc] sm:$0xf]  ;;  %v1212_v19 = vsel %vm792_vm8, 0, %v1211_v15  ;;  %v1218_v26 = vpack.i.b16 %v1217_v17, %v1216_v22  ;;  %v1222_v28 = vshrl.u32 %v1193_v23, 16 }
 0x27d   : > { %v1291_v18 = vsel %vm1229_vm10, %v1228_v16, 0  ;;  %v1223_v24 = vshrl.u32 %v1212_v19, 16  ;;  %v1221_v27 = vpack.i.b16 %v1212_v19, %v1193_v23 }
 0x27e   : > { %1300 = vmatpush.bf16.xpose.msrb.mxu1 %v1291_v18 }
 0x27f   : > { %v1224_v29 = vpack.i.b16 %v1223_v24, %v1222_v28 }
 0x280   : > { %1989 = vmatmul.msk.bf16.vlgmr.msra.gmra.mxu2 %vm1229_vm10, %v1215_v21 }
 0x282   : > { %1990 = vmatmul.msk.bf16.vlgmr.msra.gmra.mxu3 %vm1229_vm10, %v1218_v26 }
 0x283   : > { %1991 = vmatmul.msk.bf16.vlgmr.msrb.gmra.mxu0 %vm1229_vm10, %v1221_v27 }
 0x285   : > { %1992 = vmatmul.msk.bf16.vlgmr.msrb.gmra.mxu1 %vm1229_vm10, %v1224_v29 }
 0x300   : > { %v1283_v30 = vpop.f32.mrf.mxu0 }
 0x301   : > { %v1312_v31 = vsel %vm1229_vm10, %v1283_v30, -inf }
 0x302   : > { %v1302_v32 = vpop.f32.mrf.mxu1  ;;  %1313 = vmax.xlane.f32.xlu1 %v1312_v31 }
 0x303   : > { %v1245_v33 = vpop.f32.mrf.mxu2  ;;  %v1315_v34 = vsel %vm1229_vm10, %v1302_v32, -inf }
 0x304   : > { %1316 = vmax.xlane.f32.xlu2 %v1315_v34  ;;  %v1306_v40 = vsel %vm1229_vm10, %v1245_v33, -inf }
 0x305   : > { %v1264_v35 = vpop.f32.mrf.mxu3 }
 0x306   : > { %v1309_v36 = vsel %vm1229_vm10, %v1264_v35, -inf }
 0x307   : > { %1310 = vmax.xlane.f32.xlu0 %v1309_v36 }
 0x308   : > { %v1285_v37 = vpop.f32.mrf.mxu0 }
 0x30a   : > { %v1304_v38 = vpop.f32.mrf.mxu1 }
 0x30b   : > { %v1247_v39 = vpop.f32.mrf.mxu2 }
 0x30c   : > { %1307 = vmax.xlane.f32.xlu2 %v1306_v40 }
 0x30d   : > { %v1266_v41 = vpop.f32.mrf.mxu3 }
 0x31b   : > { %840 = vrot.lane.b32.xlu0 %v2821_v20, %s2529_s24  ;;  %838 = vrot.lane.b32.xlu1 %v2814_v6, %s2529_s24 }
 0x324   : > { %836 = vrot.lane.b32.xlu2 %v2812_v5, %s2529_s24  ;;  %s3140_s24 = sld [smem:[#allocation40_spill]] }
 0x375   : > { %v1314_v43 = vpop.xlane.xlu1 %1313 }
 0x376   : > { %v1320_v44 = vsub.f32 %v1283_v30, %v1314_v43 }
 0x377   : > { %v1317_v45 = vpop.xlane.xlu2 %1316 }
 0x378   : > { %v1326_v46 = vmul.f32 1.442695, %v1320_v44  ;;  %v1321_v52 = vsub.f32 %v1302_v32, %v1317_v45 }
 0x37a   : > { %2186 = vpow2.f32 %v1326_v46  ;;  %v1311_v47 = vpop.xlane.xlu0 %1310  ;;  %v1328_v54 = vmul.f32 1.442695, %v1321_v52 }
 0x37b   : > { %v1319_v48 = vsub.f32 %v1264_v35, %v1311_v47 }
 0x37d   : > { %v1324_v49 = vmul.f32 1.442695, %v1319_v48 }
 0x37f   : > { %2188 = vpow2.f32 %v1324_v49  ;;  %v1308_v50 = vpop.xlane.xlu2 %1307 }
 0x380   : > { %v2912_v51 = vpop.eup %2186  ;;  %v1318_v20 = vsub.f32 %v1245_v33, %v1308_v50 }
 0x381   : > { %v1336_v6 = vsel %vm1229_vm10, %v2912_v51, 0.0 }
 0x382   : > { %v1322_v53 = vmul.f32 1.442695, %v1318_v20  ;;  %1337 = vadd.xlane.f32.xlu1 %v1336_v6 }
 0x384   : > { %2190 = vpow2.f32 %v1322_v53 }
 0x385   : > { %v2916_v5 = vpop.eup %2188  ;;  %2192 = vpow2.f32 %v1328_v54 }
 0x386   : > { %v1333_v55 = vsel %vm1229_vm10, %v2916_v5, 0.0 }
 0x387   : > { %v837_v56 = vpop.permute.xlu2 %836  ;;  %1334 = vadd.xlane.f32.xlu0 %v1333_v55 }
 0x388   : > { %v844_v58 = vpack.i.b16 %v837_v56, %v835_v42  ;;  %v846_v59 = vshrl.u32 %v837_v56, 16 }
 0x38a   : > { %v2920_v60 = vpop.eup %2190  ;;  %v847_v61 = vpack.i.b16 %v846_v59, %v845_v57  ;;  %v858_v63 = vperm.slane %v844_v58, %v2817_v12 }
 0x38b   : > { %v1330_v62 = vsel %vm1229_vm10, %v2920_v60, 0.0  ;;  %v2926_v8 = vpop.eup %2192 }
 0x38c   : > { %1331 = vadd.xlane.f32.xlu2 %v1330_v62  ;;  %v884_v2 = vperm.slane %v847_v61, %v2817_v12  ;;  %v866_v9 = vrot.slane %v858_v63, 4  ;;  %v1339_v19 = vsel %vm1229_vm10, %v2926_v8, 0.0 }
 0x38d   : > { %v839_v0 = vpop.permute.xlu1 %838  ;;  %v841_v1 = vpop.permute.xlu0 %840 }
 0x38e   : > { %v851_v4 = vshrl.u32 %v839_v0, 16  ;;  %v850_v3 = vpack.i.b16 %v841_v1, %v839_v0  ;;  %v852_v7 = vshrl.u32 %v841_v1, 16  ;;  %v892_v14 = vrot.slane %v884_v2, 4 }
 0x390   : > { %v853_v10 = vpack.i.b16 %v852_v7, %v851_v4  ;;  %v863_v13 = vperm.slane %v850_v3, %v2817_v12 }
 0x392   : > { %v864_v15 = vrot.slane %v863_v13, 4  ;;  %v867_v16 = vsel %vm792_vm8, %v863_v13, %v866_v9  ;;  %v889_v17 = vperm.slane %v853_v10, %v2817_v12 }
 0x393   : > { %v875_v18 = vperm.slane %v867_v16, %v2828_v25 }
 0x394   : > { %v865_v21 = vsel %vm792_vm8, %v864_v15, %v858_v63  ;;  %v890_v22 = vrot.slane %v889_v17, 4  ;;  %v893_v23 = vsel %vm792_vm8, %v889_v17, %v892_v14  ;;  %1340 = vadd.xlane.f32.xlu2 %v1339_v19 }
 0x395   : > { %v871_v24 = vperm.slane %v865_v21, %v2828_v25  ;;  %v878_v26 = vrot.slane %v875_v18, 4  ;;  %v901_v27 = vperm.slane %v893_v23, %v2828_v25 }
 0x396   : > { %v891_v28 = vsel %vm792_vm8, %v890_v22, %v884_v2 }
 0x397   : > { %v876_v29 = vrot.slane %v871_v24, 4  ;;  %v879_v30 = vsel %vm792_vm8, 0, %v878_v26  ;;  %v897_v31 = vperm.slane %v891_v28, %v2828_v25  ;;  %v904_v32 = vrot.slane %v901_v27, 4 }
 0x398   : > { %v970_v33 = vrot.slane %v879_v30, 4  ;;  %v965_v37 = vsel %vm792_vm8, %v878_v26, %v871_v24 }
 0x399   : > { %v877_v34 = vsel %vm792_vm8, 0, %v876_v29  ;;  %v902_v35 = vrot.slane %v897_v31, 4  ;;  %v905_v36 = vsel %vm792_vm8, 0, %v904_v32  ;;  %v984_v42 = vsel %vm792_vm8, %v904_v32, %v897_v31 }
 0x39a   : > { %v971_v38 = vsel %vm792_vm8, %v970_v33, %v877_v34  ;;  %v989_v39 = vrot.slane %v905_v36, 4  ;;  %v969_v44 = vperm.slane %v965_v37, %v2817_v12  ;;  %v988_v48 = vperm.slane %v984_v42, %v2817_v12 }
 0x39b   : > { %v903_v40 = vsel %vm792_vm8, 0, %v902_v35  ;;  %v975_v41 = vperm.slane %v971_v38, %v2817_v12 }
 0x39c   : > { %v990_v43 = vsel %vm792_vm8, %v989_v39, %v903_v40 }
 0x39d   : > { %v976_v45 = vrot.slane %v975_v41, 4  ;;  %v994_v46 = vperm.slane %v990_v43, %v2817_v12 }
 0x39f   : > { %v977_v47 = vsel %vm792_vm8, %v976_v45, %v969_v44  ;;  %v995_v49 = vrot.slane %v994_v46, 4 }
 0x3a0   : > { %v981_v50 = vperm.slane %v977_v47, %v2828_v25 }
 0x3a1   : > { %v996_v20 = vsel %vm792_vm8, %v995_v49, %v988_v48 }
 0x3a2   : > { %v982_v6 = vrot.slane %v981_v50, 4  ;;  %v1000_v52 = vperm.slane %v996_v20, %v2828_v25  ;;  %v1007_v53 = vshrl.u32 %v981_v50, 16 }
 0x3a4   : > { %v983_v54 = vsel %vm792_vm8, 0, %v982_v6  ;;  %v1001_v55 = vrot.slane %v1000_v52, 4  ;;  %v1005_v56 = vpack.i.b16 %v1000_v52, %v981_v50  ;;  %v1008_v57 = vshrl.u32 %v1000_v52, 16 }
 0x3a5   : > { %v1015_v62 = vshrl.u32 %v983_v54, 16 }
 0x3a6   : > { %v1002_v58 = vsel %vm792_vm8, 0, %v1001_v55  ;;  %v1009_v59 = vpack.i.b16 %v1008_v57, %v1007_v53  ;;  %1019 = vst.msk [vmem:[#allocation3] sm:$0xf] %vm960_vm9, %v1005_v56 }
 0x3a7   : > { %v1013_v61 = vpack.i.b16 %v1002_v58, %v983_v54  ;;  %v1016_v63 = vshrl.u32 %v1002_v58, 16 }
 0x3a8   : > { %1020 = vst.msk [vmem:[#allocation3 + $0x4] sm:$0xf] %vm960_vm9, %v1009_v59 }
 0x3a9   : > { %v1017_v0 = vpack.i.b16 %v1016_v63, %v1015_v62  ;;  %1021 = vst.msk [vmem:[#allocation3 + $0x8] sm:$0xf] %vm960_vm9, %v1013_v61 }
 0x3ab   : > { %1022 = vst.msk [vmem:[#allocation3 + $0xc] sm:$0xf] %vm960_vm9, %v1017_v0 }
 0x3ad   : > { %v1406_v1 = vld [vmem:[#allocation3] sm:$0xf] }
 0x3ae   : > { %v1415_v2 = vsel %vm1413_vm11, %v1406_v1, 0 }
 0x3af   : > { %1424 = vmatpush.bf16.msrb.mxu2 %v1415_v2  ;;  %v1407_v4 = vld [vmem:[#allocation3 + $0x4] sm:$0xf] }
 0x3b0   : > { %v1434_v3 = vsel %vm1413_vm11, %v1407_v4, 0  ;;  %v1408_v7 = vld [vmem:[#allocation3 + $0x8] sm:$0xf] }
 0x3b1   : > { %1443 = vmatpush.bf16.msrb.mxu3 %v1434_v3  ;;  %v1453_v9 = vsel %vm1413_vm11, %v1408_v7, 0 }
 0x3b2   : > { %1462 = vmatpush.bf16.msra.mxu0 %v1453_v9  ;;  %v1409_v10 = vld [vmem:[#allocation3 + $0xc] sm:$0xf] }
 0x3b3   : > { %v1472_v13 = vsel %vm1413_vm11, %v1409_v10, 0 }
 0x3b4   : > { %1481 = vmatpush.bf16.msra.mxu1 %v1472_v13 }
 0x3f5   : > { %v1338_v14 = vpop.xlane.xlu1 %1337 }
 0x3f6   : > { %2194 = vrcp.f32 %v1338_v14  ;;  %v1383_v21 = vand.u32 2147483648, %v1338_v14  ;;  %v1381_v24 = vand.u32 2147483647, %v1338_v14  ;;  %vm1377_vm13 = vweird.f32 %v1338_v14 }
 0x3f8   : > { %v1384_v28 = vor.u32 1.1754944e-38, %v1383_v21  ;;  %vm1382_vm15 = vcmp.eq.f32.partialorder %v1381_v24, 8.507059e+37 }
 0x3fa   : > { %v1335_v15 = vpop.xlane.xlu0 %1334 }
 0x3fb   : > { %2196 = vrcp.f32 %v1335_v15  ;;  %v1368_v31 = vand.u32 2147483648, %v1335_v15  ;;  %v1366_v35 = vand.u32 2147483647, %v1335_v15  ;;  %vm1362_vm2 = vweird.f32 %v1335_v15 }
 0x3fc   : > { %v2195_v16 = vpop.eup %2194 }
 0x3fd   : > { %v1373_v17 = vmul.f32 %v2195_v16, %v1338_v14  ;;  %vm1378_vm12 = vweird.f32 %v2195_v16  ;;  %v1369_v40 = vor.u32 1.1754944e-38, %v1368_v31  ;;  %vm1367_vm4 = vcmp.eq.f32.partialorder %v1366_v35, 8.507059e+37 }
 0x3fe   : > { %vm1379_vm14 = vmor %vm1377_vm13, %vm1378_vm12 }
 0x3ff   : > { %v1374_v18 = vsub.f32 1.0, %v1373_v17  ;;  %v1332_v19 = vpop.xlane.xlu2 %1331 }
 0x400   : > { %2198 = vrcp.f32 %v1332_v19  ;;  %v1353_v43 = vand.u32 2147483648, %v1332_v19  ;;  %v1351_v46 = vand.u32 2147483647, %v1332_v19  ;;  %vm1347_vm6 = vweird.f32 %v1332_v19 }
 0x401   : > { %v2197_v22 = vpop.eup %2196  ;;  %v1375_v23 = vmul.f32 %v2195_v16, %v1374_v18 }
 0x402   : > { %v1358_v26 = vmul.f32 %v2197_v22, %v1335_v15  ;;  %vm1363_vm1 = vweird.f32 %v2197_v22  ;;  %v1354_v50 = vor.u32 1.1754944e-38, %v1353_v43  ;;  %vm1352_vm9 = vcmp.eq.f32.partialorder %v1351_v46, 8.507059e+37 }
 0x403   : > { %v1376_v27 = vadd.f32 %v2195_v16, %v1375_v23  ;;  %vm1364_vm3 = vmor %vm1362_vm2, %vm1363_vm1  ;;  %vm1613_vm1 = vcmask 195584  }
 0x404   : > { %v1359_v29 = vsub.f32 1.0, %v1358_v26 }
 0x405   : > { %v1380_v30 = vsel %vm1379_vm14, %v2195_v16, %v1376_v27 }
 0x406   : > { %v2199_v32 = vpop.eup %2198  ;;  %v1385_v33 = vsel %vm1382_vm15, %v1384_v28, %v1380_v30  ;;  %v1360_v34 = vmul.f32 %v2197_v22, %v1359_v29  ;;  %vm1611_vm15 = vcmask 130048  }
 0x407   : > { %v1386_v36 = vmul.f32 %v2912_v51, %v1385_v33  ;;  %v1343_v37 = vmul.f32 %v2199_v32, %v1332_v19  ;;  %v1341_v38 = vpop.xlane.xlu2 %1340  ;;  %vm1348_vm5 = vweird.f32 %v2199_v32 }
 0x408   : > { %v1361_v39 = vadd.f32 %v2197_v22, %v1360_v34  ;;  %2200 = vrcp.f32 %v1341_v38  ;;  %vm1349_vm7 = vmor %vm1347_vm6, %vm1348_vm5  ;;  %v1398_v56 = vand.u32 2147483648, %v1341_v38  ;;  %v1396_v58 = vand.u32 2147483647, %v1341_v38 }
 0x409   : > { %v1344_v41 = vsub.f32 1.0, %v1343_v37  ;;  %v1404_v42 = vpack.c.bf16 %v1386_v36, %v1386_v36  ;;  %vm1392_vm12 = vweird.f32 %v1341_v38 }
 0x40a   : > { %v1365_v44 = vsel %vm1364_vm3, %v2197_v22, %v1361_v39  ;;  %v1399_v61 = vor.u32 1.1754944e-38, %v1398_v56  ;;  %vm1397_vm14 = vcmp.eq.f32.partialorder %v1396_v58, 8.507059e+37 }
 0x40b   : > { %v1345_v45 = vmul.f32 %v2199_v32, %v1344_v41  ;;  %1995 = vmatmul.msk.bf16.vlgmr.msra.gmra.mxu0 %vm1229_vm10, %v1404_v42  ;;  %v1370_v47 = vsel %vm1367_vm4, %v1369_v40, %v1365_v44 }
 0x40c   : > { %v1371_v51 = vmul.f32 %v2916_v5, %v1370_v47 }
 0x40d   : > { %v1346_v48 = vadd.f32 %v2199_v32, %v1345_v45 }
 0x40e   : > { %v2201_v49 = vpop.eup %2200  ;;  %v1403_v20 = vpack.c.bf16 %v1371_v51, %v1371_v51 }
 0x40f   : > { %v1388_v6 = vmul.f32 %v2201_v49, %v1341_v38  ;;  %v1350_v52 = vsel %vm1349_vm7, %v2199_v32, %v1346_v48  ;;  %vm1393_vm11 = vweird.f32 %v2201_v49 }
 0x410   : > { %1994 = vmatmul.msk.bf16.vlgmr.msrb.gmra.mxu3 %vm1229_vm10, %v1403_v20  ;;  %v1355_v53 = vsel %vm1352_vm9, %v1354_v50, %v1350_v52  ;;  %vm1394_vm13 = vmor %vm1392_vm12, %vm1393_vm11 }
 0x411   : > { %v1389_v54 = vsub.f32 1.0, %v1388_v6  ;;  %v1356_v55 = vmul.f32 %v2920_v60, %v1355_v53 }
 0x413   : > { %v1390_v57 = vmul.f32 %v2201_v49, %v1389_v54  ;;  %v1402_v5 = vpack.c.bf16 %v1356_v55, %v1356_v55 }
 0x415   : > { %v1391_v59 = vadd.f32 %v2201_v49, %v1390_v57  ;;  %1993 = vmatmul.msk.bf16.vlgmr.msrb.gmra.mxu2 %vm1229_vm10, %v1402_v5 }
 0x417   : > { %v1395_v62 = vsel %vm1394_vm13, %v2201_v49, %v1391_v59 }
 0x418   : > { %v1400_v63 = vsel %vm1397_vm14, %v1399_v61, %v1395_v62 }
 0x419   : > { %v1401_v0 = vmul.f32 %v2926_v8, %v1400_v63 }
 0x41b   : > { %v1405_v1 = vpack.c.bf16 %v1401_v0, %v1401_v0 }
 0x41d   : > { %1996 = vmatmul.msk.bf16.vlgmr.msra.gmra.mxu1 %vm1229_vm10, %v1405_v1 }
 0x488   : > { %v1464_v60 = vpop.f32.mrf.mxu0 }
 0x489   : > { %v1487_v3 = vrot.slane %v1464_v60, 4 }
 0x490   : > { %v1466_v2 = vpop.f32.mrf.mxu0 }
 0x493   : > { %v1445_v4 = vpop.f32.mrf.mxu3 }
 0x494   : > { %v1502_v9 = vrot.slane %v1445_v4, 4 }
 0x498   : > { %v1426_v7 = vpop.f32.mrf.mxu2 }
 0x499   : > { %v1489_v10 = vsel %vm792_vm8, %v1487_v3, %v1426_v7  ;;  %v1490_v13 = vrot.slane %v1426_v7, 4 }
 0x49a   : > { %v1495_v14 = vperm.slane %v1489_v10, %v2817_v12  ;;  %v1483_v15 = vpop.f32.mrf.mxu1 }
 0x49b   : > { %v1491_v16 = vsel %vm792_vm8, %v1464_v60, %v1490_v13  ;;  %v1500_v17 = vrot.slane %v1483_v15, 4  ;;  %v1503_v8 = vsel %vm792_vm8, %v1483_v15, %v1502_v9  ;;  %v1447_v18 = vpop.f32.mrf.mxu3 }
 0x49c   : > { %v1499_v19 = vperm.slane %v1491_v16, %v2817_v12  ;;  %v1511_v21 = vperm.slane %v1503_v8, %v2817_v12  ;;  %v1514_v23 = vrot.slane %v1495_v14, 4 }
 0x49d   : > { %v1501_v22 = vsel %vm792_vm8, %v1500_v17, %v1445_v4 }
 0x49e   : > { %v1526_v24 = vrot.slane %v1499_v19, 4  ;;  %v1507_v26 = vperm.slane %v1501_v22, %v2817_v12  ;;  %v1524_v27 = vrot.slane %v1511_v21, 4  ;;  %v2175_v22 = vld [vmem:[%s3135_s17] ss:$0 sm:$0xff]  ;;  %s676_s17 = scalar_lea.vmem [#allocation16], %s1963_s8 }
 0x4a0   : > { %v1512_v28 = vrot.slane %v1507_v26, 4  ;;  %v1515_v29 = vsel %vm792_vm8, %v1507_v26, %v1514_v23  ;;  %v1525_v30 = vsel %vm792_vm8, %v1524_v27, %v1499_v19  ;;  %v1527_v31 = vsel %vm792_vm8, %v1511_v21, %v1526_v24  ;;  %v1428_v32 = vpop.f32.mrf.mxu2  ;;  %v2208_v26 = vld [vmem:[%s2751_s14] sm:$0xff]  ;;  %s1796_s14 = sshll.u32 %s676_s17, 4  ;;  %s1797_s14 = int_to_ptr.vmem [resolvable:$true] %s1796_s14 }
 0x4a1   : > { %v1523_v33 = vperm.slane %v1515_v29, %v2828_v25  ;;  %v1531_v34 = vperm.slane %v1525_v30, %v2828_v25  ;;  %v1535_v35 = vperm.slane %v1527_v31, %v2828_v25 }
 0x4a2   : > { %v1513_v36 = vsel %vm792_vm8, %v1512_v28, %v1495_v14  ;;  %v1485_v37 = vpop.f32.mrf.mxu1  ;;  %v2034_v14 = vld [vmem:[#allocation12 + $0x8] sm:$0xff] }
 0x4a3   : > { %v1519_v38 = vperm.slane %v1513_v36, %v2828_v25  ;;  %v1538_v39 = vrot.slane %v1523_v33, 4  ;;  %v1540_v40 = vrot.slane %v1531_v34, 4  ;;  %v1542_v41 = vrot.slane %v1535_v35, 4  ;;  %1645 = vmatpush.bf16.msra.mxu2 %v2034_v14  ;;  %v2036_v35 = vld [vmem:[#allocation13 + $0x8] sm:$0xff]  ;;  %v2035_v36 = vld [vmem:[#allocation13] sm:$0xff] }
 0x4a4   : > { %1715 = vmatpush.bf16.msra.mxu3 %v2036_v35 }
 0x4a5   : > { %v1536_v42 = vrot.slane %v1519_v38, 4  ;;  %v1539_v43 = vsel %vm792_vm8, 0.0, %v1538_v39  ;;  %v1543_v44 = vsel %vm792_vm8, 0.0, %v1542_v41  ;;  %v1555_v46 = vsel %vm792_vm8, %v1542_v41, %v1531_v34 }
 0x4a6   : > { %v1549_v45 = vrot.slane %v1539_v43, 4  ;;  %v1560_v47 = vrot.slane %v1543_v44, 4  ;;  %v1544_v51 = vsel %vm792_vm8, %v1538_v39, %v1519_v38  ;;  %v1541_v48 = vsel %vm792_vm8, 0.0, %v1540_v40 }
 0x4a7   : > { %v1537_v49 = vsel %vm792_vm8, 0.0, %v1536_v42  ;;  %v1548_v50 = vperm.slane %v1544_v51, %v2817_v12  ;;  %v1559_v20 = vperm.slane %v1555_v46, %v2817_v12  ;;  %v2176_v46 = vld [vmem:[%s3136_s19] ss:$0 sm:$0xff]  ;;  %s1783_s19 = scalar_lea.sflag [#allocation6], %s2745_s28 }
 0x4a8   : > { %v1550_v6 = vsel %vm792_vm8, %v1549_v45, %v1537_v49  ;;  %v1561_v52 = vsel %vm792_vm8, %v1560_v47, %v1541_v48  ;;  %1716 = vmatpush.bf16.msra.mxu3 %v2035_v36 }
 0x4a9   : > { %v1554_v53 = vperm.slane %v1550_v6, %v2817_v12  ;;  %v1565_v54 = vperm.slane %v1561_v52, %v2817_v12  ;;  %v1568_v55 = vrot.slane %v1548_v50, 4  ;;  %v1580_v56 = vrot.slane %v1559_v20, 4  ;;  %v2038_v6 = vld [vmem:[#allocation15 + $0x8] sm:$0xff] }
 0x4aa   : > { %1773 = vmatpush.bf16.msrb.mxu0 %v2038_v6 }
 0x4ab   : > { %v1569_v57 = vsel %vm792_vm8, %v1554_v53, %v1568_v55  ;;  %v1581_v58 = vsel %vm792_vm8, %v1565_v54, %v1580_v56  ;;  %v1566_v5 = vrot.slane %v1554_v53, 4  ;;  %v1578_v59 = vrot.slane %v1565_v54, 4  ;;  %v2037_v55 = vld [vmem:[#allocation15] sm:$0xff] }
 0x4ac   : > { %v1577_v61 = vperm.slane %v1569_v57, %v2828_v25  ;;  %v1589_v62 = vperm.slane %v1581_v58, %v2828_v25 }
 0x4ad   : > { %v1567_v63 = vsel %vm792_vm8, %v1566_v5, %v1548_v50  ;;  %v1579_v0 = vsel %vm792_vm8, %v1578_v59, %v1559_v20  ;;  %v2178_v20 = vld [vmem:[%s3138_s29] ss:$0 sm:$0xff] }
 0x4ae   : > { %v1596_v1 = vrot.slane %v1577_v61, 4  ;;  %v1594_v60 = vrot.slane %v1589_v62, 4  ;;  %v1573_v12 = vperm.slane %v1567_v63, %v2828_v25  ;;  %v1585_v2 = vperm.slane %v1579_v0, %v2828_v25  ;;  %v2033_v25 = vld [vmem:[#allocation12] sm:$0xff]  ;;  %1774 = vmatpush.bf16.msrb.mxu0 %v2037_v55 }
 0x4af   : > { %1646 = vmatpush.bf16.msra.mxu2 %v2033_v25 }
 0x4b0   : > { %v1597_v4 = vsel %vm792_vm8, %v1589_v62, %v1596_v1  ;;  %v1595_v3 = vsel %vm792_vm8, %v1594_v60, %v1577_v61  ;;  %v1590_v7 = vrot.slane %v1585_v2, 4  ;;  %v1592_v9 = vrot.slane %v1573_v12, 4 }
 0x4b1   : > { %1607 = vrot.lane.b32.xlu2 %v1597_v4, %s2533_s9  ;;  %1603 = vrot.lane.b32.xlu1 %v1595_v3, %s2534_s21  ;;  %s3141_s21 = sld [smem:[#allocation41_spill]] }
 0x4b2   : > { %v1593_v10 = vsel %vm792_vm8, %v1585_v2, %v1592_v9  ;;  %v1591_v13 = vsel %vm792_vm8, %v1590_v7, %v1573_v12  ;;  %v2179_v9 = vld [vmem:[%s3140_s24] ss:$0 sm:$0xff] }
 0x4b3   : > { %1599 = vrot.lane.b32.xlu0 %v1593_v10, %s2535_s23 }
 0x4b7   : > { %s3142_s0 = smov %s3141_s21  ;;  %s1794_s27 = scalar_lea.hbm %s3141_s21, %s2026_s11 }
 0x4b8   : > { %s1798_s4 = sshll.u32 %s1794_s27, 4  ;;  %s2439_s8 = scalar_lea.hbm %s3142_s0, 16  ;;  %s1799_s4 = int_to_ptr.hbm [resolvable:$true] %s1798_s4 }
 0x4b9   : > { %s2433_s30 = sshra.s32 %s1799_s4, 4  ;;  %s2434_s30 = int_to_ptr.hbm [resolvable:$true] %s2433_s30 }
 0x4ba   : > { %s2435_s13 = scalar_lea.hbm %s2434_s30, 8  ;;  %p2440_p10 = scmp.lt.s32.totalorder %s2434_s30, %s3142_s0 }
 0x4bb   : > { %p2436_p1 = scmp.ne.s32.totalorder %s2434_s30, %s2435_s13  ;;  %p2441_p11 = scmp.lt.s32.totalorder %s2439_s8, %s2435_s13 }
 0x4bd   : > { %p2437_p3 = pnand %p2436_p1, %p2718_p4  ;;  %p2442_p12 = por %p2441_p11, %p2440_p10 }
 0x4bf   : > { %p2438_p9 = pneg %p2437_p3 }
 0x4c1   : > { %p2443_p13 = pnand %p2442_p12, %p2438_p9 }
 0x50b   : > { %v1608_v8 = vpop.permute.xlu2 %1607 }
 0x523   : > { %v1604_v16 = vpop.permute.xlu1 %1603 }
 0x525   : > { %v1600_v15 = vpop.permute.xlu0 %1599 }
 0x526   : > { %v1610_v17 = vsel %vm1229_vm10, %v1591_v13, %v1600_v15 }
 0x527   : > { %v1612_v18 = vsel %vm1611_vm15, %v1610_v17, %v1604_v16 }
 0x528   : > { %v1614_v19 = vsel %vm1613_vm1, %v1612_v18, %v1608_v8 }
 0x529   : > { %v1615_v21 = vpack.c.bf16 %v1614_v19, %v1614_v19 }
 0x52b   : > { %2005 = vmatmul.msk.bf16.vlgmr.msra.gmra.mxu2 %vm686_vm0, %v1615_v21 }
 0x5ae   : > { %v1648_v23 = vpop.f32.mrf.mxu2 }
 0x5af   : > { %v1649_v24 = vadd.f32 %v2175_v22, %v1648_v23 }
 0x5b1   : > { %v3016_v27 = vadd.f32 %v2208_v26, %v1649_v24 }
 0x5b3   : > { %v1655_v28 = vsel %vm686_vm0, %v3016_v27, 0.0 }
 0x5b4   : > { %1656 = vadd.xlane.f32.xlu0 %v1655_v28 }
 0x5b6   : > { %v1650_v29 = vpop.f32.mrf.mxu2 }
 0x627   : > { %v1657_v30 = vpop.xlane.xlu0 %1656 }
 0x628   : > { %v1658_v31 = vmul.f32 %v1657_v30, %v2778_v11 }
 0x62a   : > { %v1659_v32 = vsub.f32 %v3016_v27, %v1658_v31 }
 0x62c   : > { %v1660_v33 = vmul.f32 %v1659_v32, %v1659_v32 }
 0x62e   : > { %v1661_v34 = vsel %vm686_vm0, %v1660_v33, 0.0 }
 0x62f   : > { %1662 = vadd.xlane.f32.xlu1 %v1661_v34 }
 0x6a2   : > { %v1663_v37 = vpop.xlane.xlu1 %1662 }
 0x6a3   : > { %v1664_v38 = vmul.f32 %v1663_v37, %v2778_v11  ;;  %v2177_v11 = vld [vmem:[%s3137_s15] ss:$0 sm:$0xff] }
 0x6a5   : > { %v1665_v39 = vadd.f32 1e-05, %v1664_v38 }
 0x6a7   : > { %2202 = vrsqrt.f32 %v1665_v39  ;;  %vm1672_vm10 = vweird.f32 %v1665_v39 }
 0x6ad   : > { %v2203_v40 = vpop.eup %2202 }
 0x6ae   : > { %v1667_v41 = vmul.f32 %v2203_v40, %v1665_v39  ;;  %vm1673_vm8 = vweird.f32 %v2203_v40 }
 0x6af   : > { %vm1674_vm2 = vmor %vm1672_vm10, %vm1673_vm8 }
 0x6b0   : > { %v1668_v42 = vmul.f32 %v2203_v40, %v1667_v41 }
 0x6b2   : > { %v1669_v43 = vmul.f32 0.5, %v1668_v42 }
 0x6b4   : > { %v1670_v44 = vsub.f32 1.5, %v1669_v43 }
 0x6b6   : > { %v1671_v45 = vmul.f32 %v2203_v40, %v1670_v44 }
 0x6b8   : > { %v1675_v47 = vsel %vm1674_vm2, %v2203_v40, %v1671_v45 }
 0x6b9   : > { %v1676_v51 = vmul.f32 %v1675_v47, %v1659_v32 }
 0x6bb   : > { %v1680_v48 = vmul.f32 %v2176_v46, %v1676_v51 }
 0x6bd   : > { %v1684_v49 = vadd.f32 %v2177_v11, %v1680_v48 }
 0x6bf   : > { %v1685_v50 = vpack.c.bf16 %v1684_v49, %v1684_v49 }
 0x6c1   : > { %2014 = vmatmul.msk.bf16.vlgmr.msra.gmra.mxu3 %vm686_vm0, %v1685_v50 }
 0x744   : > { %v1718_v52 = vpop.f32.mrf.mxu3 }
 0x745   : > { %v1719_v53 = vadd.f32 %v2178_v20, %v1718_v52 }
 0x747   : > { %v2015_v54 = vmul.f32 -1.702, %v1719_v53 }
 0x749   : > { %v1724_v56 = vmul.f32 1.442695, %v2015_v54 }
 0x74b   : > { %2204 = vpow2.f32 %v1724_v56 }
 0x74c   : > { %v1720_v57 = vpop.f32.mrf.mxu3 }
 0x751   : > { %v2205_v58 = vpop.eup %2204 }
 0x752   : > { %v1726_v5 = vadd.f32 1.0, %v2205_v58 }
 0x754   : > { %2206 = vrcp.f32 %v1726_v5  ;;  %v1738_v63 = vand.u32 2147483648, %v1726_v5  ;;  %v1736_v1 = vand.u32 2147483647, %v1726_v5  ;;  %vm1732_vm4 = vweird.f32 %v1726_v5 }
 0x756   : > { %v1739_v12 = vor.u32 1.1754944e-38, %v1738_v63  ;;  %vm1737_vm6 = vcmp.eq.f32.partialorder %v1736_v1, 8.507059e+37 }
 0x75a   : > { %v2207_v59 = vpop.eup %2206 }
 0x75b   : > { %v1728_v61 = vmul.f32 %v2207_v59, %v1726_v5  ;;  %vm1733_vm3 = vweird.f32 %v2207_v59 }
 0x75c   : > { %vm1734_vm5 = vmor %vm1732_vm4, %vm1733_vm3 }
 0x75d   : > { %v1729_v62 = vsub.f32 1.0, %v1728_v61 }
 0x75f   : > { %v1730_v0 = vmul.f32 %v2207_v59, %v1729_v62 }
 0x761   : > { %v1731_v60 = vadd.f32 %v2207_v59, %v1730_v0 }
 0x763   : > { %v1735_v2 = vsel %vm1734_vm5, %v2207_v59, %v1731_v60 }
 0x764   : > { %v1740_v4 = vsel %vm1737_vm6, %v1739_v12, %v1735_v2 }
 0x765   : > { %v1742_v3 = vmul.f32 %v1740_v4, %v1719_v53 }
 0x767   : > { %v1743_v7 = vpack.c.bf16 %v1742_v3, %v1742_v3 }
 0x769   : > { %2024 = vmatmul.msk.bf16.vlgmr.msrb.gmra.mxu0 %vm686_vm0, %v1743_v7 }
 0x7e6   : > { %v1776_v10 = vpop.f32.mrf.mxu0 }
 0x7e7   : > { %v1777_v13 = vadd.f32 %v2179_v9, %v1776_v10 }
 0x7e9   : > { %v1780_v14 = vadd.f32 %v1777_v13, %v3016_v27 }
 0x7eb   : > { %1781 = vst.msk [vmem:[%s676_s17] sm:$0xff] %vm686_vm0, %v1780_v14 }
 0x7ec   : > { %2446 = shalt.err (!%p2443_p13)
}
 0x7ed   : > { %2063 = dma.vmem_to_hbm [thread:$0]  (%p2718_p4), %s1797_s14, 128, %s1799_s4, %s1783_s19  }
 0x7ee   : > { %v1778_v25 = vpop.f32.mrf.mxu0 }
 0x7ef PF: > { %s3144_s28 = sld [smem:[#allocation23_spill]]  ;;  %p2089_p0 = pnand %p1957_p6, %p2726_p7 }
 0x7f1   : > { %p2090_p2 = pneg %p2089_p0 }
 0x7f5   : > { %s1810_s11 = sand.u32 1, %s3144_s28  }
 0x7f6   : > { %s1811_s20 = scalar_lea.sflag [#allocation6], %s1810_s11 }
 0x7f7   : > { %2492 = dma.done.wait (%p2090_p2), %s1811_s20, 128  }
 0x7f8   : > { %2494 = vsyncadd (%p2090_p2), %s1811_s20, 4294967168  ;;  %s37_s26 = sadd.s32 1, %s2517_s26   ;;  %s3146_s18 = sld [smem:[#allocation24_spill]] }
 0x7f9   : > { %p34_p5 = scmp.ge.s32.totalorder %s37_s26, 4   ;;  %s3147_s23 = sld [smem:[#allocation28_spill]] }
 0x7fa   : > { %s3148_s12 = sld [smem:[#allocation26_spill]]  ;;  %s3149_s21 = smov %s2501_s22 }
 0x7fb   : > { %s3151_s24 = smov %s2513_s25 }
 0x7fc   :  { %36 = sbr.rel (!%p34_p5) target bundleno = 23 (0x17), region = 166 }
 0x7fe   : > { %s3150_s22 = smov %s3146_s18 }
 0x800   : > { %s3152_s25 = smov %s3148_s12 }
 0x801   :  { %1817 = vsyncpa [#allocation5], 1 }
 0x802   :  { %1819 = vsyncpa [#allocation5 + $0x1], 1 }
 0x803   :  { %1820 = vsyncpa [#allocation8], 1 }
 0x804   :  { %1822 = vsyncpa [#allocation8 + $0x1], 1 }
 0x805   :  { %1823 = vsyncpa [#allocation11], 1 }
 0x806   :  { %1824 = vsyncpa [#allocation14], 1 }
 0x807   :  { %1825 = vsyncpa [#allocation6], 1 }
 0x808   :  { %1827 = vsyncpa [#allocation6 + $0x1], 1 }

</bundles_post_ra>
